<compile_context>
chip_gen: v6e
topology: v6e:2x2x1
jax: 0.10.0
libtpu: 0.0.40
codegen_flags: <defaults>
</compile_context>

<pallas_src>
import functools

import jax
import jax.numpy as jnp
from jax import lax
from jax.experimental import pallas as pl
from jax.experimental.pallas import tpu as pltpu

_VMEM_LIMIT = 48 * 1024 * 1024  # > v5e's 16 MiB default, < v7x's 64 MiB physical


# --------------------------------------------------------------------------
# helpers
# --------------------------------------------------------------------------
def _round_up(x, m):
    return (x + m - 1) // m * m


def _pick_tile(dim, target, quantum=128):
    """Largest multiple of `quantum` that divides `dim` and is <= target,
    falling back to the full dim (always legal for a BlockSpec)."""
    best = dim
    t = quantum
    while t <= min(dim, target):
        if dim % t == 0:
            best = t
        t += quantum
    return best


def _gelu_tanh(x):
    # gelu_pytorch_tanh: 0.5*x*(1+tanh(sqrt(2/pi)*(x+0.044715*x^3)))
    c = 0.7978845608028654  # sqrt(2/pi)
    return 0.5 * x * (1.0 + jnp.tanh(c * (x + 0.044715 * x * x * x)))


def _layernorm_f32(x_f32, g_ref, b_ref, eps):
    mu = jnp.mean(x_f32, axis=-1, keepdims=True)
    xc = x_f32 - mu
    var = jnp.mean(xc * xc, axis=-1, keepdims=True)
    xn = xc * lax.rsqrt(var + eps)
    return xn * g_ref[...].astype(jnp.float32) + b_ref[...].astype(jnp.float32)


def _cparams(sem):
    return pltpu.CompilerParams(dimension_semantics=sem,
                                vmem_limit_bytes=_VMEM_LIMIT)


# --------------------------------------------------------------------------
# Kernel 1: LayerNorm + (x @ W + b)     (LN1 + QKV projection)
#   LN computed once per row tile (j == 0) into VMEM scratch, reused over j.
# --------------------------------------------------------------------------
def _ln_matmul_bias_kernel(x_ref, g_ref, bt_ref, w_ref, b_ref, o_ref, xn_ref,
                           *, eps):
    @pl.when(pl.program_id(1) == 0)
    def _():
        x = x_ref[...].astype(jnp.float32)
        xn_ref[...] = _layernorm_f32(x, g_ref, bt_ref, eps).astype(xn_ref.dtype)

    acc = jnp.dot(xn_ref[...], w_ref[...], preferred_element_type=jnp.float32)
    o_ref[...] = (acc + b_ref[...].astype(jnp.float32)).astype(o_ref.dtype)


def _ln_matmul_bias(x, gamma, beta, w, b, *, eps, tm, tn):
    M, H = x.shape
    N = w.shape[1]
    grid = (M // tm, N // tn)
    kernel = functools.partial(_ln_matmul_bias_kernel, eps=eps)
    return pl.pallas_call(
        kernel,
        out_shape=jax.ShapeDtypeStruct((M, N), x.dtype),
        grid_spec=pltpu.PrefetchScalarGridSpec(
            num_scalar_prefetch=0,
            grid=grid,
            in_specs=[
                pl.BlockSpec((tm, H), lambda i, j: (i, 0)),   # x rows
                pl.BlockSpec((1, H), lambda i, j: (0, 0)),    # ln gamma
                pl.BlockSpec((1, H), lambda i, j: (0, 0)),    # ln beta
                pl.BlockSpec((H, tn), lambda i, j: (0, j)),   # W column tile
                pl.BlockSpec((1, tn), lambda i, j: (0, j)),   # bias tile
            ],
            out_specs=pl.BlockSpec((tm, tn), lambda i, j: (i, j)),
            scratch_shapes=[pltpu.VMEM((tm, H), x.dtype)],    # cached LN(x)
        ),
        # j must be sequential per row tile so the LN scratch is reused.
        compiler_params=_cparams(("parallel", "arbitrary")),
        cost_estimate=pl.CostEstimate(
            flops=2 * M * H * N,
            transcendentals=0,
            bytes_accessed=(M * H + H * N + M * N) * x.dtype.itemsize),
    )(x, gamma, beta, w, b)


# --------------------------------------------------------------------------
# Kernel 2: multi-head attention.
#   qkv layout: (B, S_pad, 3*nh*Dp), per-head 128-aligned column groups
#   [Q h0 | Q h1 | ... | K h0 | ... | V h0 | ...].  Heads selected via the
#   BlockSpec index_map.  K transposed once per head into scratch.  Softmax
#   normalization deferred to the (tq, Dp) output.
# --------------------------------------------------------------------------
def _attention_kernel(q_ref, k_ref, v_ref, o_ref, kt_ref, *, scale, valid_len):
    @pl.when(pl.program_id(2) == 0)
    def _():
        kt_ref[...] = k_ref[0].T            # (Dp, S_pad), once per (b, h)

    q = (q_ref[0].astype(jnp.float32) * scale).astype(q_ref.dtype)
    s = jnp.dot(q, kt_ref[...], preferred_element_type=jnp.float32)
    if valid_len < s.shape[-1]:             # static: only if S was padded
        key_idx = lax.broadcasted_iota(jnp.int32, s.shape, 1)
        s = jnp.where(key_idx < valid_len, s, -jnp.inf)
    m = jnp.max(s, axis=-1, keepdims=True)
    p = jnp.exp(s - m)
    denom = jnp.sum(p, axis=-1, keepdims=True)
    out = jnp.dot(p.astype(v_ref.dtype), v_ref[0],
                  preferred_element_type=jnp.float32)
    # exact (non-approx) reciprocal keeps the f32 test tolerance tight while
    # still avoiding the full (tq, S_pad) divide.
    out = out * pl.reciprocal(denom, approx=False)
    o_ref[0] = out.astype(o_ref.dtype)


def _mha(qkv3, *, num_heads, Dp, S_pad, scale, valid_len, tq):
    B = qkv3.shape[0]
    grid = (B, num_heads, S_pad // tq)
    kernel = functools.partial(_attention_kernel, scale=scale,
                               valid_len=valid_len)
    nh = num_heads
    return pl.pallas_call(
        kernel,
        out_shape=jax.ShapeDtypeStruct((B, S_pad, nh * Dp), qkv3.dtype),
        grid_spec=pltpu.PrefetchScalarGridSpec(
            num_scalar_prefetch=0,
            grid=grid,
            in_specs=[
                pl.BlockSpec((1, tq, Dp),
                             lambda b, h, i: (b, i, h)),            # Q tile
                pl.BlockSpec((1, S_pad, Dp),
                             lambda b, h, i: (b, 0, nh + h)),       # full K
                pl.BlockSpec((1, S_pad, Dp),
                             lambda b, h, i: (b, 0, 2 * nh + h)),   # full V
            ],
            out_specs=pl.BlockSpec((1, tq, Dp), lambda b, h, i: (b, i, h)),
            scratch_shapes=[pltpu.VMEM((Dp, S_pad), qkv3.dtype)],   # K^T cache
        ),
        compiler_params=_cparams(("parallel", "parallel", "arbitrary")),
        cost_estimate=pl.CostEstimate(
            flops=4 * B * nh * S_pad * S_pad * Dp,
            transcendentals=B * nh * S_pad * S_pad,
            bytes_accessed=4 * B * nh * S_pad * Dp * qkv3.dtype.itemsize),
    )(qkv3, qkv3, qkv3)


# --------------------------------------------------------------------------
# Kernel 3: (x @ W + b) + residual      (out_proj + residual add)
# --------------------------------------------------------------------------
def _matmul_bias_residual_kernel(x_ref, w_ref, b_ref, r_ref, o_ref):
    acc = jnp.dot(x_ref[...], w_ref[...], preferred_element_type=jnp.float32)
    acc = acc + b_ref[...].astype(jnp.float32) + r_ref[...].astype(jnp.float32)
    o_ref[...] = acc.astype(o_ref.dtype)


def _matmul_bias_residual(x, w, b, r, *, tm, tn):
    M, K = x.shape
    N = w.shape[1]
    grid = (M // tm, N // tn)
    return pl.pallas_call(
        _matmul_bias_residual_kernel,
        out_shape=jax.ShapeDtypeStruct((M, N), r.dtype),
        grid_spec=pltpu.PrefetchScalarGridSpec(
            num_scalar_prefetch=0,
            grid=grid,
            in_specs=[
                pl.BlockSpec((tm, K), lambda i, j: (i, 0)),
                pl.BlockSpec((K, tn), lambda i, j: (0, j)),
                pl.BlockSpec((1, tn), lambda i, j: (0, j)),
                pl.BlockSpec((tm, tn), lambda i, j: (i, j)),
            ],
            out_specs=pl.BlockSpec((tm, tn), lambda i, j: (i, j)),
        ),
        compiler_params=_cparams(("parallel", "parallel")),
        cost_estimate=pl.CostEstimate(
            flops=2 * M * K * N,
            transcendentals=0,
            bytes_accessed=(M * K + K * N + 2 * M * N) * x.dtype.itemsize),
    )(x, w, b, r)


# --------------------------------------------------------------------------
# Kernel 4: LayerNorm + MLP (fc1 -> gelu_tanh -> fc2) + residual,
#   intermediate dim tiled; f32 accumulator + cached LN in VMEM scratch.
# --------------------------------------------------------------------------
def _ln_mlp_residual_kernel(x_ref, g_ref, bt_ref, w1_ref, b1_ref, w2_ref,
                            b2_ref, o_ref, acc_ref, xn_ref, *, eps):
    k = pl.program_id(1)

    @pl.when(k == 0)
    def _():
        acc_ref[...] = jnp.zeros_like(acc_ref)
        x = x_ref[...].astype(jnp.float32)
        xn_ref[...] = _layernorm_f32(x, g_ref, bt_ref, eps).astype(xn_ref.dtype)

    h = jnp.dot(xn_ref[...], w1_ref[...], preferred_element_type=jnp.float32)
    h = _gelu_tanh(h + b1_ref[...].astype(jnp.float32))
    acc_ref[...] += jnp.dot(h.astype(w2_ref.dtype), w2_ref[...],
                            preferred_element_type=jnp.float32)

    @pl.when(k == pl.num_programs(1) - 1)
    def _():
        o_ref[...] = (acc_ref[...] + b2_ref[...].astype(jnp.float32)
                      + x_ref[...].astype(jnp.float32)).astype(o_ref.dtype)


def _ln_mlp_residual(x, gamma, beta, w1, b1, w2, b2, *, eps, tm, ti):
    M, H = x.shape
    I = w1.shape[1]
    grid = (M // tm, I // ti)
    kernel = functools.partial(_ln_mlp_residual_kernel, eps=eps)
    return pl.pallas_call(
        kernel,
        out_shape=jax.ShapeDtypeStruct((M, H), x.dtype),
        grid_spec=pltpu.PrefetchScalarGridSpec(
            num_scalar_prefetch=0,
            grid=grid,
            in_specs=[
                pl.BlockSpec((tm, H), lambda i, k: (i, 0)),   # x (LN in + res)
                pl.BlockSpec((1, H), lambda i, k: (0, 0)),    # ln gamma
                pl.BlockSpec((1, H), lambda i, k: (0, 0)),    # ln beta
                pl.BlockSpec((H, ti), lambda i, k: (0, k)),   # W1 column tile
                pl.BlockSpec((1, ti), lambda i, k: (0, k)),   # b1 tile
                pl.BlockSpec((ti, H), lambda i, k: (k, 0)),   # W2 row tile
                pl.BlockSpec((1, H), lambda i, k: (0, 0)),    # b2
            ],
            out_specs=pl.BlockSpec((tm, H), lambda i, k: (i, 0)),
            scratch_shapes=[pltpu.VMEM((tm, H), jnp.float32),  # accumulator
                            pltpu.VMEM((tm, H), x.dtype)],     # cached LN(x)
        ),
        compiler_params=_cparams(("parallel", "arbitrary")),
        cost_estimate=pl.CostEstimate(
            flops=4 * M * H * I,
            transcendentals=M * I,
            bytes_accessed=(3 * M * H + 2 * H * I) * x.dtype.itemsize),
    )(x, gamma, beta, w1, b1, w2, b2)


# --------------------------------------------------------------------------
# One-time weight preparation (hoisted out of the jitted forward path).
#   - QKV weight/bias re-laid out so every head occupies a 128-aligned,
#     Dp-wide column group (exact: padded Q/K/V columns are zero).
#   - out_proj rows padded to match the padded attention output layout.
#   - intermediate dim padded to a multiple of 512 (zero rows/cols -> exact).
# --------------------------------------------------------------------------
def prepare_params(params, num_heads):
    H = params["w_qkv"].shape[0]
    D = H // num_heads
    Dp = _round_up(D, 128)
    I = params["w_fc1"].shape[1]
    I_pad = _round_up(I, 512)

    w_qkv = params["w_qkv"].reshape(H, 3, num_heads, D)
    w_qkv = jnp.pad(w_qkv, ((0, 0), (0, 0), (0, 0), (0, Dp - D)))
    w_qkv = w_qkv.reshape(H, 3 * num_heads * Dp)
    b_qkv = params["b_qkv"].reshape(3, num_heads, D)
    b_qkv = jnp.pad(b_qkv, ((0, 0), (0, 0), (0, Dp - D)))
    b_qkv = b_qkv.reshape(1, 3 * num_heads * Dp)

    w_out = params["w_out"].reshape(num_heads, D, H)
    w_out = jnp.pad(w_out, ((0, 0), (0, Dp - D), (0, 0)))
    w_out = w_out.reshape(num_heads * Dp, H)

    w_fc1 = jnp.pad(params["w_fc1"], ((0, 0), (0, I_pad - I)))
    b_fc1 = jnp.pad(params["b_fc1"], ((0, I_pad - I),)).reshape(1, I_pad)
    w_fc2 = jnp.pad(params["w_fc2"], ((0, I_pad - I), (0, 0)))

    return {
        "ln1_g": params["ln1_g"].reshape(1, H),
        "ln1_b": params["ln1_b"].reshape(1, H),
        "ln2_g": params["ln2_g"].reshape(1, H),
        "ln2_b": params["ln2_b"].reshape(1, H),
        "w_qkv": w_qkv, "b_qkv": b_qkv,
        "w_out": w_out, "b_out": params["b_out"].reshape(1, H),
        "w_fc1": w_fc1, "b_fc1": b_fc1,
        "w_fc2": w_fc2, "b_fc2": params["b_fc2"].reshape(1, H),
    }


# --------------------------------------------------------------------------
# Encoder-layer wrapper
# --------------------------------------------------------------------------
@functools.partial(jax.jit, static_argnames=("num_heads", "eps"))
def idefics2_encoder_layer(hidden_states, prepared, *, num_heads, eps=1e-6):
    """hidden_states: [B, S, H].  `prepared` from prepare_params()."""
    B, S, H = hidden_states.shape
    assert H % num_heads == 0
    D = H // num_heads
    Dp = _round_up(D, 128)
    scale = float(D) ** -0.5

    # Row tiling: S padded to a multiple of the row tile so every kernel sees
    # M = B * S_pad rows (no per-kernel padding passes).
    tm = 512 if S >= 512 else _round_up(S, 8)
    S_pad = _round_up(S, tm)
    tq = 256 if tm % 256 == 0 else tm          # q-tile divides tm divides S_pad
    M = B * S_pad

    N_qkv = 3 * num_heads * Dp
    tn_qkv = _pick_tile(N_qkv, 512)
    tn_out = _pick_tile(H, 512)
    I_pad = prepared["w_fc1"].shape[1]
    ti = _pick_tile(I_pad, 512)

    x = hidden_states
    if S_pad != S:
        x = jnp.pad(x, ((0, 0), (0, S_pad - S), (0, 0)))
    x2d = x.reshape(M, H)

    # ---- LN1 + QKV projection (per-head 128-aligned output columns) -------
    qkv = _ln_matmul_bias(x2d, prepared["ln1_g"], prepared["ln1_b"],
                          prepared["w_qkv"], prepared["b_qkv"],
                          eps=eps, tm=tm, tn=tn_qkv)
    qkv3 = qkv.reshape(B, S_pad, N_qkv)        # free reshape, no transpose

    # ---- multi-head attention (dropout is identity at inference) ----------
    attn = _mha(qkv3, num_heads=num_heads, Dp=Dp, S_pad=S_pad,
                scale=scale, valid_len=S, tq=tq)
    attn2d = attn.reshape(M, num_heads * Dp)   # free reshape, no transpose

    # ---- out_proj + residual ----------------------------------------------
    x2 = _matmul_bias_residual(attn2d, prepared["w_out"], prepared["b_out"],
                               x2d, tm=tm, tn=tn_out)

    # ---- LN2 + MLP + residual (I-tiled accumulator) ------------------------
    y = _ln_mlp_residual(x2, prepared["ln2_g"], prepared["ln2_b"],
                         prepared["w_fc1"], prepared["b_fc1"],
                         prepared["w_fc2"], prepared["b_fc2"],
                         eps=eps, tm=tm, ti=ti)

    y = y.reshape(B, S_pad, H)
    return y[:, :S] if S_pad != S else y


# --------------------------------------------------------------------------
# Pure-JAX reference
# --------------------------------------------------------------------------
def _reference(x, params, num_heads, eps):
    f32 = jnp.float32
    B, S, H = x.shape
    D = H // num_heads
    xf = x.astype(f32)

    def ln(z, g, b):
        mu = z.mean(-1, keepdims=True)
        var = ((z - mu) ** 2).mean(-1, keepdims=True)
        return (z - mu) * lax.rsqrt(var + eps) * g.astype(f32) + b.astype(f32)

    h1 = ln(xf, params["ln1_g"], params["ln1_b"])
    qkv = h1 @ params["w_qkv"].astype(f32) + params["b_qkv"].astype(f32)
    q, k, v = jnp.split(qkv, 3, axis=-1)

    def heads(t):
        return t.reshape(B, S, num_heads, D).transpose(0, 2, 1, 3)

    q, k, v = heads(q), heads(k), heads(v)
    s = jnp.einsum("bhqd,bhkd->bhqk", q, k) * (D ** -0.5)
    p = jax.nn.softmax(s, axis=-1)
    o = jnp.einsum("bhqk,bhkd->bhqd", p, v)
    o = o.transpose(0, 2, 1, 3).reshape(B, S, H)
    x2 = xf + o @ params["w_out"].astype(f32) + params["b_out"].astype(f32)

    h2 = ln(x2, params["ln2_g"], params["ln2_b"])
    m = _gelu_tanh(h2 @ params["w_fc1"].astype(f32) + params["b_fc1"].astype(f32))
    y = x2 + m @ params["w_fc2"].astype(f32) + params["b_fc2"].astype(f32)
    return y.astype(x.dtype)


if __name__ == "__main__":
    # Small Idefics2-vision-like config: hidden=128, heads=4 (head_dim=32),
    # intermediate=256, seq=16, batch=2.  (Real config: H=1152, I=4304, S~4900,
    # heads=16, head_dim=72 -> padded to 128 — same code path; use bf16 there.)
    B, S, H, num_heads, I = 2, 16, 128, 4, 256
    eps = 1e-6
    dtype = jnp.float32

    key = jax.random.PRNGKey(0)
    keys = jax.random.split(key, 13)

    def nrm(k, shape, scale=0.02):
        return jax.random.normal(k, shape, dtype=dtype) * scale

    hidden_states = jax.random.normal(keys[0], (B, S, H), dtype=dtype)
    params = {
        "ln1_g": jnp.ones((H,), dtype) + nrm(keys[1], (H,)),
        "ln1_b": nrm(keys[2], (H,)),
        "w_qkv": nrm(keys[3], (H, 3 * H)),
        "b_qkv": nrm(keys[4], (3 * H,)),
        "w_out": nrm(keys[5], (H, H)),
        "b_out": nrm(keys[6], (H,)),
        "ln2_g": jnp.ones((H,), dtype) + nrm(keys[7], (H,)),
        "ln2_b": nrm(keys[8], (H,)),
        "w_fc1": nrm(keys[9], (H, I)),
        "b_fc1": nrm(keys[10], (I,)),
        "w_fc2": nrm(keys[11], (I, H)),
        "b_fc2": nrm(keys[12], (H,)),
    }

    # One-time weight re-layout / padding (outside the jitted forward).
    prepared = jax.tree_util.tree_map(jax.block_until_ready,
                                      prepare_params(params, num_heads))

    out = idefics2_encoder_layer(hidden_states, prepared,
                                 num_heads=num_heads, eps=eps)
    out = jax.block_until_ready(out)

    ref = _reference(hidden_states, params, num_heads, eps)
    assert out.shape == (B, S, H)
    assert jnp.allclose(out, ref, atol=2e-3, rtol=2e-3), "mismatch vs reference"

    print("KERNEL_OK")
</pallas_src>

<mosaic_0001>
module attributes {stable_mosaic.version = 11 : i64} {
  func.func @_ln_matmul_bias_kernel(%arg0: i32, %arg1: i32, %arg2: memref<16x128xf32, #tpu.memory_space<vmem>>, %arg3: memref<1x128xf32, #tpu.memory_space<vmem>>, %arg4: memref<1x128xf32, #tpu.memory_space<vmem>>, %arg5: memref<128x512xf32, #tpu.memory_space<vmem>>, %arg6: memref<1x512xf32, #tpu.memory_space<vmem>>, %arg7: memref<16x512xf32, #tpu.memory_space<vmem>>, %arg8: memref<16x128xf32, #tpu.memory_space<vmem>>) attributes {dimension_semantics = [#tpu.dimension_semantics<parallel>, #tpu.dimension_semantics<arbitrary>], iteration_bounds = array<i64: 2, 3>, scalar_prefetch = 0 : i64, scratch_operands = 1 : i64, tpu.core_type = #tpu.core_type<tc>, window_params = [{transform_indices = @transform_0, window_bounds = array<i64: 16, 128>}, {pipeline_mode = #tpu.pipeline_mode<synchronous>, transform_indices = @transform_1, window_bounds = array<i64: 1, 128>}, {pipeline_mode = #tpu.pipeline_mode<synchronous>, transform_indices = @transform_2, window_bounds = array<i64: 1, 128>}, {transform_indices = @transform_3, window_bounds = array<i64: 128, 512>}, {transform_indices = @transform_4, window_bounds = array<i64: 1, 512>}, {transform_indices = @transform_5, window_bounds = array<i64: 16, 512>}]} {
    %c0_i32 = arith.constant 0 : i32
    %0 = arith.cmpi eq, %arg1, %c0_i32 : i32
    %1 = arith.extui %0 : i1 to i32
    %c0_i32_0 = arith.constant 0 : i32
    %2 = arith.cmpi ne, %1, %c0_i32_0 : i32
    scf.if %2 {
      %c0_8 = arith.constant 0 : index
      %c0_9 = arith.constant 0 : index
      %10 = vector.load %arg2[%c0_8, %c0_9] : memref<16x128xf32, #tpu.memory_space<vmem>>, vector<16x128xf32>
      %cst_10 = arith.constant dense<0.000000e+00> : vector<16xf32>
      %11 = vector.multi_reduction <add>, %10, %cst_10 [1] : vector<16x128xf32> to vector<16xf32>
      %12 = vector.shape_cast %11 : vector<16xf32> to vector<16x1xf32>
      %cst_11 = arith.constant 1.280000e+02 : f32
      %13 = vector.broadcast %cst_11 : f32 to vector<16x1xf32>
      %14 = arith.divf %12, %13 : vector<16x1xf32>
      %15 = vector.broadcast %14 : vector<16x1xf32> to vector<16x128xf32>
      %16 = arith.subf %10, %15 : vector<16x128xf32>
      %17 = arith.mulf %16, %16 : vector<16x128xf32>
      %cst_12 = arith.constant dense<0.000000e+00> : vector<16xf32>
      %18 = vector.multi_reduction <add>, %17, %cst_12 [1] : vector<16x128xf32> to vector<16xf32>
      %19 = vector.shape_cast %18 : vector<16xf32> to vector<16x1xf32>
      %cst_13 = arith.constant 1.280000e+02 : f32
      %20 = vector.broadcast %cst_13 : f32 to vector<16x1xf32>
      %21 = arith.divf %19, %20 : vector<16x1xf32>
      %cst_14 = arith.constant 9.99999997E-7 : f32
      %22 = vector.broadcast %cst_14 : f32 to vector<16x1xf32>
      %23 = arith.addf %21, %22 : vector<16x1xf32>
      %24 = math.rsqrt %23 : vector<16x1xf32>
      %25 = vector.broadcast %24 : vector<16x1xf32> to vector<16x128xf32>
      %26 = arith.mulf %16, %25 : vector<16x128xf32>
      %c0_15 = arith.constant 0 : index
      %c0_16 = arith.constant 0 : index
      %27 = vector.load %arg3[%c0_15, %c0_16] : memref<1x128xf32, #tpu.memory_space<vmem>>, vector<1x128xf32>
      %28 = vector.broadcast %27 : vector<1x128xf32> to vector<16x128xf32>
      %29 = arith.mulf %26, %28 : vector<16x128xf32>
      %c0_17 = arith.constant 0 : index
      %c0_18 = arith.constant 0 : index
      %30 = vector.load %arg4[%c0_17, %c0_18] : memref<1x128xf32, #tpu.memory_space<vmem>>, vector<1x128xf32>
      %31 = vector.broadcast %30 : vector<1x128xf32> to vector<16x128xf32>
      %32 = arith.addf %29, %31 : vector<16x128xf32>
      %c0_19 = arith.constant 0 : index
      %c0_20 = arith.constant 0 : index
      %33 = vector.load %arg8[%c0_19, %c0_20] : memref<16x128xf32, #tpu.memory_space<vmem>>, vector<16x128xf32>
      tpu.vector_store %arg8[%c0_19, %c0_20], %32 {strides = array<i32>} : memref<16x128xf32, #tpu.memory_space<vmem>>, vector<16x128xf32>,
    } else {
    }
    %c0 = arith.constant 0 : index
    %c0_1 = arith.constant 0 : index
    %3 = vector.load %arg8[%c0, %c0_1] : memref<16x128xf32, #tpu.memory_space<vmem>>, vector<16x128xf32>
    %c0_2 = arith.constant 0 : index
    %c0_3 = arith.constant 0 : index
    %4 = vector.load %arg5[%c0_2, %c0_3] : memref<128x512xf32, #tpu.memory_space<vmem>>, vector<128x512xf32>
    %cst = arith.constant dense<0.000000e+00> : vector<16x512xf32>
    %5 = tpu.matmul %3, %4, %cst {dimension_numbers = #tpu.dot_dimension_numbers<[1], [0], [0], [1], [0, 0, 1, 1], [], []>} : vector<16x128xf32>, vector<128x512xf32>, vector<16x512xf32> -> vector<16x512xf32>
    %c0_4 = arith.constant 0 : index
    %c0_5 = arith.constant 0 : index
    %6 = vector.load %arg6[%c0_4, %c0_5] : memref<1x512xf32, #tpu.memory_space<vmem>>, vector<1x512xf32>
    %7 = vector.broadcast %6 : vector<1x512xf32> to vector<16x512xf32>
    %8 = arith.addf %5, %7 : vector<16x512xf32>
    %c0_6 = arith.constant 0 : index
    %c0_7 = arith.constant 0 : index
    %9 = vector.load %arg7[%c0_6, %c0_7] : memref<16x512xf32, #tpu.memory_space<vmem>>, vector<16x512xf32>
    tpu.vector_store %arg7[%c0_6, %c0_7], %8 {strides = array<i32>} : memref<16x512xf32, #tpu.memory_space<vmem>>, vector<16x512xf32>,
    return
  }
  func.func @transform_0(%arg0: i32, %arg1: i32) -> (i32, i32) {
    %c0_i32 = arith.constant 0 : i32
    %c0_i32_0 = arith.constant 0 : i32
    return %arg0, %c0_i32 : i32, i32
  }
  func.func @transform_1(%arg0: i32, %arg1: i32) -> (i32, i32) {
    %c0_i32 = arith.constant 0 : i32
    %c0_i32_0 = arith.constant 0 : i32
    %c0_i32_1 = arith.constant 0 : i32
    return %c0_i32, %c0_i32_0 : i32, i32
  }
  func.func @transform_2(%arg0: i32, %arg1: i32) -> (i32, i32) {
    %c0_i32 = arith.constant 0 : i32
    %c0_i32_0 = arith.constant 0 : i32
    %c0_i32_1 = arith.constant 0 : i32
    return %c0_i32, %c0_i32_0 : i32, i32
  }
  func.func @transform_3(%arg0: i32, %arg1: i32) -> (i32, i32) {
    %c0_i32 = arith.constant 0 : i32
    %c0_i32_0 = arith.constant 0 : i32
    return %c0_i32, %arg1 : i32, i32
  }
  func.func @transform_4(%arg0: i32, %arg1: i32) -> (i32, i32) {
    %c0_i32 = arith.constant 0 : i32
    %c0_i32_0 = arith.constant 0 : i32
    return %c0_i32, %arg1 : i32, i32
  }
  func.func @transform_5(%arg0: i32, %arg1: i32) -> (i32, i32) {
    %c0_i32 = arith.constant 0 : i32
    return %arg0, %arg1 : i32, i32
  }
}

module attributes {stable_mosaic.version = 11 : i64} {
  func.func @_attention_kernel(%arg0: i32, %arg1: i32, %arg2: i32, %arg3: memref<1x16x128xf32, #tpu.memory_space<vmem>>, %arg4: memref<1x16x128xf32, #tpu.memory_space<vmem>>, %arg5: memref<1x16x128xf32, #tpu.memory_space<vmem>>, %arg6: memref<1x16x128xf32, #tpu.memory_space<vmem>>, %arg7: memref<128x16xf32, #tpu.memory_space<vmem>>) attributes {dimension_semantics = [#tpu.dimension_semantics<parallel>, #tpu.dimension_semantics<parallel>, #tpu.dimension_semantics<arbitrary>], iteration_bounds = array<i64: 2, 4, 1>, scalar_prefetch = 0 : i64, scratch_operands = 1 : i64, tpu.core_type = #tpu.core_type<tc>, window_params = [{transform_indices = @transform_0, window_bounds = array<i64: 1, 16, 128>}, {transform_indices = @transform_1, window_bounds = array<i64: 1, 16, 128>}, {transform_indices = @transform_2, window_bounds = array<i64: 1, 16, 128>}, {transform_indices = @transform_3, window_bounds = array<i64: 1, 16, 128>}]} {
    %c0_i32 = arith.constant 0 : i32
    %0 = arith.cmpi eq, %arg2, %c0_i32 : i32
    %1 = arith.extui %0 : i1 to i32
    %c0_i32_0 = arith.constant 0 : i32
    %2 = arith.cmpi ne, %1, %c0_i32_0 : i32
    scf.if %2 {
      %c0_15 = arith.constant 0 : index
      %c0_16 = arith.constant 0 : index
      %c0_17 = arith.constant 0 : index
      %25 = vector.load %arg4[%c0_15, %c0_16, %c0_17] : memref<1x16x128xf32, #tpu.memory_space<vmem>>, vector<1x16x128xf32>
      %26 = vector.shape_cast %25 : vector<1x16x128xf32> to vector<16x128xf32>
      %27 = tpu.transpose %26, [1, 0] : vector<16x128xf32> -> vector<128x16xf32>
      %c0_18 = arith.constant 0 : index
      %c0_19 = arith.constant 0 : index
      %28 = vector.load %arg7[%c0_18, %c0_19] : memref<128x16xf32, #tpu.memory_space<vmem>>, vector<128x16xf32>
      tpu.vector_store %arg7[%c0_18, %c0_19], %27 {strides = array<i32>} : memref<128x16xf32, #tpu.memory_space<vmem>>, vector<128x16xf32>,
    } else {
    }
    %c0 = arith.constant 0 : index
    %c0_1 = arith.constant 0 : index
    %c0_2 = arith.constant 0 : index
    %3 = vector.load %arg3[%c0, %c0_1, %c0_2] : memref<1x16x128xf32, #tpu.memory_space<vmem>>, vector<1x16x128xf32>
    %4 = vector.shape_cast %3 : vector<1x16x128xf32> to vector<16x128xf32>
    %cst = arith.constant 0.176776692 : f32
    %5 = vector.broadcast %cst : f32 to vector<16x128xf32>
    %6 = arith.mulf %4, %5 : vector<16x128xf32>
    %c0_3 = arith.constant 0 : index
    %c0_4 = arith.constant 0 : index
    %7 = vector.load %arg7[%c0_3, %c0_4] : memref<128x16xf32, #tpu.memory_space<vmem>>, vector<128x16xf32>
    %cst_5 = arith.constant dense<0.000000e+00> : vector<16x16xf32>
    %8 = tpu.matmul %6, %7, %cst_5 {dimension_numbers = #tpu.dot_dimension_numbers<[1], [0], [0], [1], [0, 0, 1, 1], [], []>} : vector<16x128xf32>, vector<128x16xf32>, vector<16x16xf32> -> vector<16x16xf32>
    %cst_6 = arith.constant dense<0xFF800000> : vector<16xf32>
    %9 = vector.multi_reduction <maximumf>, %8, %cst_6 [1] : vector<16x16xf32> to vector<16xf32>
    %10 = vector.shape_cast %9 : vector<16xf32> to vector<16x1xf32>
    %11 = vector.broadcast %10 : vector<16x1xf32> to vector<16x16xf32>
    %12 = arith.subf %8, %11 : vector<16x16xf32>
    %13 = math.exp %12 : vector<16x16xf32>
    %cst_7 = arith.constant dense<0.000000e+00> : vector<16xf32>
    %14 = vector.multi_reduction <add>, %13, %cst_7 [1] : vector<16x16xf32> to vector<16xf32>
    %15 = vector.shape_cast %14 : vector<16xf32> to vector<16x1xf32>
    %c0_8 = arith.constant 0 : index
    %c0_9 = arith.constant 0 : index
    %c0_10 = arith.constant 0 : index
    %16 = vector.load %arg5[%c0_8, %c0_9, %c0_10] : memref<1x16x128xf32, #tpu.memory_space<vmem>>, vector<1x16x128xf32>
    %17 = vector.shape_cast %16 : vector<1x16x128xf32> to vector<16x128xf32>
    %cst_11 = arith.constant dense<0.000000e+00> : vector<16x128xf32>
    %18 = tpu.matmul %13, %17, %cst_11 {dimension_numbers = #tpu.dot_dimension_numbers<[1], [0], [0], [1], [0, 0, 1, 1], [], []>} : vector<16x16xf32>, vector<16x128xf32>, vector<16x128xf32> -> vector<16x128xf32>
    %19 = tpu.reciprocal %15 : vector<16x1xf32> -> vector<16x1xf32>
    %20 = vector.broadcast %19 : vector<16x1xf32> to vector<16x128xf32>
    %21 = arith.mulf %18, %20 : vector<16x128xf32>
    %c0_12 = arith.constant 0 : index
    %c0_13 = arith.constant 0 : index
    %c0_14 = arith.constant 0 : index
    %22 = vector.load %arg6[%c0_12, %c0_13, %c0_14] : memref<1x16x128xf32, #tpu.memory_space<vmem>>, vector<1x16x128xf32>
    %23 = vector.shape_cast %22 : vector<1x16x128xf32> to vector<16x128xf32>
    %24 = vector.shape_cast %21 : vector<16x128xf32> to vector<1x16x128xf32>
    tpu.vector_store %arg6[%c0_12, %c0_13, %c0_14], %24 {strides = array<i32>} : memref<1x16x128xf32, #tpu.memory_space<vmem>>, vector<1x16x128xf32>,
    return
  }
  func.func @transform_0(%arg0: i32, %arg1: i32, %arg2: i32) -> (i32, i32, i32) {
    %c0_i32 = arith.constant 0 : i32
    return %arg0, %arg2, %arg1 : i32, i32, i32
  }
  func.func @transform_1(%arg0: i32, %arg1: i32, %arg2: i32) -> (i32, i32, i32) {
    %c4_i32 = arith.constant 4 : i32
    %0 = arith.addi %c4_i32, %arg1 : i32
    %c0_i32 = arith.constant 0 : i32
    %c0_i32_0 = arith.constant 0 : i32
    return %arg0, %c0_i32, %0 : i32, i32, i32
  }
  func.func @transform_2(%arg0: i32, %arg1: i32, %arg2: i32) -> (i32, i32, i32) {
    %c8_i32 = arith.constant 8 : i32
    %0 = arith.addi %c8_i32, %arg1 : i32
    %c0_i32 = arith.constant 0 : i32
    %c0_i32_0 = arith.constant 0 : i32
    return %arg0, %c0_i32, %0 : i32, i32, i32
  }
  func.func @transform_3(%arg0: i32, %arg1: i32, %arg2: i32) -> (i32, i32, i32) {
    %c0_i32 = arith.constant 0 : i32
    return %arg0, %arg2, %arg1 : i32, i32, i32
  }
}

module attributes {stable_mosaic.version = 11 : i64} {
  func.func @_matmul_bias_residual_kernel(%arg0: i32, %arg1: i32, %arg2: memref<16x512xf32, #tpu.memory_space<vmem>>, %arg3: memref<512x128xf32, #tpu.memory_space<vmem>>, %arg4: memref<1x128xf32, #tpu.memory_space<vmem>>, %arg5: memref<16x128xf32, #tpu.memory_space<vmem>>, %arg6: memref<16x128xf32, #tpu.memory_space<vmem>>) attributes {dimension_semantics = [#tpu.dimension_semantics<parallel>, #tpu.dimension_semantics<parallel>], iteration_bounds = array<i64: 2, 1>, scalar_prefetch = 0 : i64, scratch_operands = 0 : i64, tpu.core_type = #tpu.core_type<tc>, window_params = [{transform_indices = @transform_0, window_bounds = array<i64: 16, 512>}, {transform_indices = @transform_1, window_bounds = array<i64: 512, 128>}, {transform_indices = @transform_2, window_bounds = array<i64: 1, 128>}, {transform_indices = @transform_3, window_bounds = array<i64: 16, 128>}, {transform_indices = @transform_4, window_bounds = array<i64: 16, 128>}]} {
    %c0 = arith.constant 0 : index
    %c0_0 = arith.constant 0 : index
    %0 = vector.load %arg2[%c0, %c0_0] : memref<16x512xf32, #tpu.memory_space<vmem>>, vector<16x512xf32>
    %c0_1 = arith.constant 0 : index
    %c0_2 = arith.constant 0 : index
    %1 = vector.load %arg3[%c0_1, %c0_2] : memref<512x128xf32, #tpu.memory_space<vmem>>, vector<512x128xf32>
    %cst = arith.constant dense<0.000000e+00> : vector<16x128xf32>
    %2 = tpu.matmul %0, %1, %cst {dimension_numbers = #tpu.dot_dimension_numbers<[1], [0], [0], [1], [0, 0, 1, 1], [], []>} : vector<16x512xf32>, vector<512x128xf32>, vector<16x128xf32> -> vector<16x128xf32>
    %c0_3 = arith.constant 0 : index
    %c0_4 = arith.constant 0 : index
    %3 = vector.load %arg4[%c0_3, %c0_4] : memref<1x128xf32, #tpu.memory_space<vmem>>, vector<1x128xf32>
    %4 = vector.broadcast %3 : vector<1x128xf32> to vector<16x128xf32>
    %5 = arith.addf %2, %4 : vector<16x128xf32>
    %c0_5 = arith.constant 0 : index
    %c0_6 = arith.constant 0 : index
    %6 = vector.load %arg5[%c0_5, %c0_6] : memref<16x128xf32, #tpu.memory_space<vmem>>, vector<16x128xf32>
    %7 = arith.addf %5, %6 : vector<16x128xf32>
    %c0_7 = arith.constant 0 : index
    %c0_8 = arith.constant 0 : index
    %8 = vector.load %arg6[%c0_7, %c0_8] : memref<16x128xf32, #tpu.memory_space<vmem>>, vector<16x128xf32>
    tpu.vector_store %arg6[%c0_7, %c0_8], %7 {strides = array<i32>} : memref<16x128xf32, #tpu.memory_space<vmem>>, vector<16x128xf32>,
    return
  }
  func.func @transform_0(%arg0: i32, %arg1: i32) -> (i32, i32) {
    %c0_i32 = arith.constant 0 : i32
    %c0_i32_0 = arith.constant 0 : i32
    return %arg0, %c0_i32 : i32, i32
  }
  func.func @transform_1(%arg0: i32, %arg1: i32) -> (i32, i32) {
    %c0_i32 = arith.constant 0 : i32
    %c0_i32_0 = arith.constant 0 : i32
    return %c0_i32, %arg1 : i32, i32
  }
  func.func @transform_2(%arg0: i32, %arg1: i32) -> (i32, i32) {
    %c0_i32 = arith.constant 0 : i32
    %c0_i32_0 = arith.constant 0 : i32
    return %c0_i32, %arg1 : i32, i32
  }
  func.func @transform_3(%arg0: i32, %arg1: i32) -> (i32, i32) {
    %c0_i32 = arith.constant 0 : i32
    return %arg0, %arg1 : i32, i32
  }
  func.func @transform_4(%arg0: i32, %arg1: i32) -> (i32, i32) {
    %c0_i32 = arith.constant 0 : i32
    return %arg0, %arg1 : i32, i32
  }
}

module attributes {stable_mosaic.version = 11 : i64} {
  func.func @_ln_mlp_residual_kernel(%arg0: i32, %arg1: i32, %arg2: memref<16x128xf32, #tpu.memory_space<vmem>>, %arg3: memref<1x128xf32, #tpu.memory_space<vmem>>, %arg4: memref<1x128xf32, #tpu.memory_space<vmem>>, %arg5: memref<128x512xf32, #tpu.memory_space<vmem>>, %arg6: memref<1x512xf32, #tpu.memory_space<vmem>>, %arg7: memref<512x128xf32, #tpu.memory_space<vmem>>, %arg8: memref<1x128xf32, #tpu.memory_space<vmem>>, %arg9: memref<16x128xf32, #tpu.memory_space<vmem>>, %arg10: memref<16x128xf32, #tpu.memory_space<vmem>>, %arg11: memref<16x128xf32, #tpu.memory_space<vmem>>) attributes {dimension_semantics = [#tpu.dimension_semantics<parallel>, #tpu.dimension_semantics<arbitrary>], iteration_bounds = array<i64: 2, 1>, scalar_prefetch = 0 : i64, scratch_operands = 2 : i64, tpu.core_type = #tpu.core_type<tc>, window_params = [{transform_indices = @transform_0, window_bounds = array<i64: 16, 128>}, {pipeline_mode = #tpu.pipeline_mode<synchronous>, transform_indices = @transform_1, window_bounds = array<i64: 1, 128>}, {pipeline_mode = #tpu.pipeline_mode<synchronous>, transform_indices = @transform_2, window_bounds = array<i64: 1, 128>}, {transform_indices = @transform_3, window_bounds = array<i64: 128, 512>}, {transform_indices = @transform_4, window_bounds = array<i64: 1, 512>}, {transform_indices = @transform_5, window_bounds = array<i64: 512, 128>}, {pipeline_mode = #tpu.pipeline_mode<synchronous>, transform_indices = @transform_6, window_bounds = array<i64: 1, 128>}, {transform_indices = @transform_7, window_bounds = array<i64: 16, 128>}]} {
    %c0_i32 = arith.constant 0 : i32
    %0 = arith.cmpi eq, %arg1, %c0_i32 : i32
    %1 = arith.extui %0 : i1 to i32
    %c0_i32_0 = arith.constant 0 : i32
    %2 = arith.cmpi ne, %1, %c0_i32_0 : i32
    scf.if %2 {
      %cst_19 = arith.constant 0.000000e+00 : f32
      %30 = vector.broadcast %cst_19 : f32 to vector<16x128xf32>
      %c0_20 = arith.constant 0 : index
      %c0_21 = arith.constant 0 : index
      %31 = vector.load %arg10[%c0_20, %c0_21] : memref<16x128xf32, #tpu.memory_space<vmem>>, vector<16x128xf32>
      tpu.vector_store %arg10[%c0_20, %c0_21], %30 {strides = array<i32>} : memref<16x128xf32, #tpu.memory_space<vmem>>, vector<16x128xf32>,
      %c0_22 = arith.constant 0 : index
      %c0_23 = arith.constant 0 : index
      %32 = vector.load %arg2[%c0_22, %c0_23] : memref<16x128xf32, #tpu.memory_space<vmem>>, vector<16x128xf32>
      %cst_24 = arith.constant dense<0.000000e+00> : vector<16xf32>
      %33 = vector.multi_reduction <add>, %32, %cst_24 [1] : vector<16x128xf32> to vector<16xf32>
      %34 = vector.shape_cast %33 : vector<16xf32> to vector<16x1xf32>
      %cst_25 = arith.constant 1.280000e+02 : f32
      %35 = vector.broadcast %cst_25 : f32 to vector<16x1xf32>
      %36 = arith.divf %34, %35 : vector<16x1xf32>
      %37 = vector.broadcast %36 : vector<16x1xf32> to vector<16x128xf32>
      %38 = arith.subf %32, %37 : vector<16x128xf32>
      %39 = arith.mulf %38, %38 : vector<16x128xf32>
      %cst_26 = arith.constant dense<0.000000e+00> : vector<16xf32>
      %40 = vector.multi_reduction <add>, %39, %cst_26 [1] : vector<16x128xf32> to vector<16xf32>
      %41 = vector.shape_cast %40 : vector<16xf32> to vector<16x1xf32>
      %cst_27 = arith.constant 1.280000e+02 : f32
      %42 = vector.broadcast %cst_27 : f32 to vector<16x1xf32>
      %43 = arith.divf %41, %42 : vector<16x1xf32>
      %cst_28 = arith.constant 9.99999997E-7 : f32
      %44 = vector.broadcast %cst_28 : f32 to vector<16x1xf32>
      %45 = arith.addf %43, %44 : vector<16x1xf32>
      %46 = math.rsqrt %45 : vector<16x1xf32>
      %47 = vector.broadcast %46 : vector<16x1xf32> to vector<16x128xf32>
      %48 = arith.mulf %38, %47 : vector<16x128xf32>
      %c0_29 = arith.constant 0 : index
      %c0_30 = arith.constant 0 : index
      %49 = vector.load %arg3[%c0_29, %c0_30] : memref<1x128xf32, #tpu.memory_space<vmem>>, vector<1x128xf32>
      %50 = vector.broadcast %49 : vector<1x128xf32> to vector<16x128xf32>
      %51 = arith.mulf %48, %50 : vector<16x128xf32>
      %c0_31 = arith.constant 0 : index
      %c0_32 = arith.constant 0 : index
      %52 = vector.load %arg4[%c0_31, %c0_32] : memref<1x128xf32, #tpu.memory_space<vmem>>, vector<1x128xf32>
      %53 = vector.broadcast %52 : vector<1x128xf32> to vector<16x128xf32>
      %54 = arith.addf %51, %53 : vector<16x128xf32>
      %c0_33 = arith.constant 0 : index
      %c0_34 = arith.constant 0 : index
      %55 = vector.load %arg11[%c0_33, %c0_34] : memref<16x128xf32, #tpu.memory_space<vmem>>, vector<16x128xf32>
      tpu.vector_store %arg11[%c0_33, %c0_34], %54 {strides = array<i32>} : memref<16x128xf32, #tpu.memory_space<vmem>>, vector<16x128xf32>,
    } else {
    }
    %c0 = arith.constant 0 : index
    %c0_1 = arith.constant 0 : index
    %3 = vector.load %arg11[%c0, %c0_1] : memref<16x128xf32, #tpu.memory_space<vmem>>, vector<16x128xf32>
    %c0_2 = arith.constant 0 : index
    %c0_3 = arith.constant 0 : index
    %4 = vector.load %arg5[%c0_2, %c0_3] : memref<128x512xf32, #tpu.memory_space<vmem>>, vector<128x512xf32>
    %cst = arith.constant dense<0.000000e+00> : vector<16x512xf32>
    %5 = tpu.matmul %3, %4, %cst {dimension_numbers = #tpu.dot_dimension_numbers<[1], [0], [0], [1], [0, 0, 1, 1], [], []>} : vector<16x128xf32>, vector<128x512xf32>, vector<16x512xf32> -> vector<16x512xf32>
    %c0_4 = arith.constant 0 : index
    %c0_5 = arith.constant 0 : index
    %6 = vector.load %arg6[%c0_4, %c0_5] : memref<1x512xf32, #tpu.memory_space<vmem>>, vector<1x512xf32>
    %7 = vector.broadcast %6 : vector<1x512xf32> to vector<16x512xf32>
    %8 = arith.addf %5, %7 : vector<16x512xf32>
    %cst_6 = arith.constant 5.000000e-01 : f32
    %9 = vector.broadcast %cst_6 : f32 to vector<16x512xf32>
    %10 = arith.mulf %9, %8 : vector<16x512xf32>
    %cst_7 = arith.constant 4.471500e-02 : f32
    %11 = vector.broadcast %cst_7 : f32 to vector<16x512xf32>
    %12 = arith.mulf %11, %8 : vector<16x512xf32>
    %13 = arith.mulf %12, %8 : vector<16x512xf32>
    %14 = arith.mulf %13, %8 : vector<16x512xf32>
    %15 = arith.addf %8, %14 : vector<16x512xf32>
    %cst_8 = arith.constant 0.797884583 : f32
    %16 = vector.broadcast %cst_8 : f32 to vector<16x512xf32>
    %17 = arith.mulf %16, %15 : vector<16x512xf32>
    %18 = math.tanh %17 : vector<16x512xf32>
    %cst_9 = arith.constant 1.000000e+00 : f32
    %19 = vector.broadcast %cst_9 : f32 to vector<16x512xf32>
    %20 = arith.addf %19, %18 : vector<16x512xf32>
    %21 = arith.mulf %10, %20 : vector<16x512xf32>
    %c0_10 = arith.constant 0 : index
    %c0_11 = arith.constant 0 : index
    %22 = vector.load %arg10[%c0_10, %c0_11] : memref<16x128xf32, #tpu.memory_space<vmem>>, vector<16x128xf32>
    %c0_12 = arith.constant 0 : index
    %c0_13 = arith.constant 0 : index
    %23 = vector.load %arg7[%c0_12, %c0_13] : memref<512x128xf32, #tpu.memory_space<vmem>>, vector<512x128xf32>
    %cst_14 = arith.constant dense<0.000000e+00> : vector<16x128xf32>
    %24 = tpu.matmul %21, %23, %cst_14 {dimension_numbers = #tpu.dot_dimension_numbers<[1], [0], [0], [1], [0, 0, 1, 1], [], []>} : vector<16x512xf32>, vector<512x128xf32>, vector<16x128xf32> -> vector<16x128xf32>
    %25 = arith.addf %22, %24 : vector<16x128xf32>
    %c0_15 = arith.constant 0 : index
    %c0_16 = arith.constant 0 : index
    %26 = vector.load %arg10[%c0_15, %c0_16] : memref<16x128xf32, #tpu.memory_space<vmem>>, vector<16x128xf32>
    tpu.vector_store %arg10[%c0_15, %c0_16], %25 {strides = array<i32>} : memref<16x128xf32, #tpu.memory_space<vmem>>, vector<16x128xf32>,
    %c0_i32_17 = arith.constant 0 : i32
    %27 = arith.cmpi eq, %arg1, %c0_i32_17 : i32
    %28 = arith.extui %27 : i1 to i32
    %c0_i32_18 = arith.constant 0 : i32
    %29 = arith.cmpi ne, %28, %c0_i32_18 : i32
    scf.if %29 {
      %c0_19 = arith.constant 0 : index
      %c0_20 = arith.constant 0 : index
      %30 = vector.load %arg10[%c0_19, %c0_20] : memref<16x128xf32, #tpu.memory_space<vmem>>, vector<16x128xf32>
      %c0_21 = arith.constant 0 : index
      %c0_22 = arith.constant 0 : index
      %31 = vector.load %arg8[%c0_21, %c0_22] : memref<1x128xf32, #tpu.memory_space<vmem>>, vector<1x128xf32>
      %32 = vector.broadcast %31 : vector<1x128xf32> to vector<16x128xf32>
      %33 = arith.addf %30, %32 : vector<16x128xf32>
      %c0_23 = arith.constant 0 : index
      %c0_24 = arith.constant 0 : index
      %34 = vector.load %arg2[%c0_23, %c0_24] : memref<16x128xf32, #tpu.memory_space<vmem>>, vector<16x128xf32>
      %35 = arith.addf %33, %34 : vector<16x128xf32>
      %c0_25 = arith.constant 0 : index
      %c0_26 = arith.constant 0 : index
      %36 = vector.load %arg9[%c0_25, %c0_26] : memref<16x128xf32, #tpu.memory_space<vmem>>, vector<16x128xf32>
      tpu.vector_store %arg9[%c0_25, %c0_26], %35 {strides = array<i32>} : memref<16x128xf32, #tpu.memory_space<vmem>>, vector<16x128xf32>,
    } else {
    }
    return
  }
  func.func @transform_0(%arg0: i32, %arg1: i32) -> (i32, i32) {
    %c0_i32 = arith.constant 0 : i32
    %c0_i32_0 = arith.constant 0 : i32
    return %arg0, %c0_i32 : i32, i32
  }
  func.func @transform_1(%arg0: i32, %arg1: i32) -> (i32, i32) {
    %c0_i32 = arith.constant 0 : i32
    %c0_i32_0 = arith.constant 0 : i32
    %c0_i32_1 = arith.constant 0 : i32
    return %c0_i32, %c0_i32_0 : i32, i32
  }
  func.func @transform_2(%arg0: i32, %arg1: i32) -> (i32, i32) {
    %c0_i32 = arith.constant 0 : i32
    %c0_i32_0 = arith.constant 0 : i32
    %c0_i32_1 = arith.constant 0 : i32
    return %c0_i32, %c0_i32_0 : i32, i32
  }
  func.func @transform_3(%arg0: i32, %arg1: i32) -> (i32, i32) {
    %c0_i32 = arith.constant 0 : i32
    %c0_i32_0 = arith.constant 0 : i32
    return %c0_i32, %arg1 : i32, i32
  }
  func.func @transform_4(%arg0: i32, %arg1: i32) -> (i32, i32) {
    %c0_i32 = arith.constant 0 : i32
    %c0_i32_0 = arith.constant 0 : i32
    return %c0_i32, %arg1 : i32, i32
  }
  func.func @transform_5(%arg0: i32, %arg1: i32) -> (i32, i32) {
    %c0_i32 = arith.constant 0 : i32
    %c0_i32_0 = arith.constant 0 : i32
    return %arg1, %c0_i32 : i32, i32
  }
  func.func @transform_6(%arg0: i32, %arg1: i32) -> (i32, i32) {
    %c0_i32 = arith.constant 0 : i32
    %c0_i32_0 = arith.constant 0 : i32
    %c0_i32_1 = arith.constant 0 : i32
    return %c0_i32, %c0_i32_0 : i32, i32
  }
  func.func @transform_7(%arg0: i32, %arg1: i32) -> (i32, i32) {
    %c0_i32 = arith.constant 0 : i32
    %c0_i32_0 = arith.constant 0 : i32
    return %arg0, %c0_i32 : i32, i32
  }
}

</mosaic_0001>

<bundles_post_ra>
// kernel: idefics2_encoder_layer.6
= control target key start
LH: loop header
LB: loop body
LE: loop exit
PB: predicated region body
PF: predicated region fallthrough
CT: control target
= control target key end

     0   :  { %s807_s15 = smov 0   ;;  %s809_s16 = smov 0   ;;  %s1065_s0 = inlined_call_operand.vmem [shape: f32[32,512], index: 0, kind: input, shape index: {}]   ;;  %s1066_s1 = inlined_call_operand.vmem [shape: f32[512,128], index: 1, kind: input, shape index: {}]   ;;  %s1067_s2 = inlined_call_operand.vmem [shape: f32[1,128], index: 2, kind: input, shape index: {}]   ;;  %s1068_s3 = inlined_call_operand.vmem [shape: f32[32,128], index: 3, kind: input, shape index: {}]   ;;  %s1069_s4 = inlined_call_operand.vmem [shape: f32[32,128], index: 4, kind: output, shape index: {}]  }
   0x1   :  { %s811_s17 = smov 0  }
   0x2 LB: > { %s26_s18 = sadd.s32 1, %s776_s16  ;;  %p646_p0 = scmp.ge.s32.totalorder %s780_s17, 1  ;;  %s780_s17 = sphi %s811_s17, %s14_s17   ;;  %s776_s16 = sphi %s809_s16, %s1072_s16   ;;  %s772_s15 = sphi %s807_s15, %s1071_s15  }
   0x3   : > { %p28_p1 = scmp.ge.s32.totalorder %s26_s18, 2  ;;  %p211_p2 = scmp.lt.s32.totalorder %s780_s17, 3 }
   0x5   : > { %s1074_s18 = smov (%p28_p1, %s26_s18), 0  ;;  %p212_p3 = pnand %p646_p0, %p211_p2 }
   0x6   : > { %s647_s9 = sshll.u32 (!%p212_p3), %s772_s15, 1 }
   0x7   : > { %215 = sbr.rel (%p212_p3) target bundleno = 255 (0xff), region = 36  ;;  %p938_p4 = scmp.lt.s32.totalorder (!%p212_p3), %s647_s9, 3 }
   0xc   : > { %v327_v0 = vld [vmem:[%s1066_s1 + $0xf8] sm:$0xff]  ;;  %v326_v4 = vld [vmem:[%s1066_s1 + $0xf0] sm:$0xff]  ;;  %v325_v8 = vld [vmem:[%s1066_s1 + $0xe8] sm:$0xff]  ;;  %s1076_s9 = smov (!%p938_p4, %s647_s9), 3 }
   0xd   : > { %v359_v1 = vld [vmem:[%s1066_s1 + $0x1f8] sm:$0xff]  ;;  %658 = vmatprep.subr.mxu0 %v327_v0  ;;  %v358_v5 = vld [vmem:[%s1066_s1 + $0x1f0] sm:$0xff]  ;;  %v357_v9 = vld [vmem:[%s1066_s1 + $0x1e8] sm:$0xff]  ;;  %s657_s12 = sshll.u32 %s1076_s9, 5  ;;  %s651_s22 = sshll.u32 %s1076_s9, 3 }
   0xe   : > { %v311_v2 = vld [vmem:[%s1066_s1 + $0x78] sm:$0xff]  ;;  %696 = vmatprep.subr.mxu1 %v359_v1  ;;  %v310_v6 = vld [vmem:[%s1066_s1 + $0x70] sm:$0xff]  ;;  %v309_v10 = vld [vmem:[%s1066_s1 + $0x68] sm:$0xff]  ;;  %s1018_s30 = scalar_lea.vmem %s1065_s0, %s657_s12  ;;  %s277_s28 = scalar_lea.vmem %s1068_s3, %s651_s22 }
   0xf   : > { %v343_v3 = vld [vmem:[%s1066_s1 + $0x178] sm:$0xff]  ;;  %659 = vmatpush3.msra.mxu0 %v311_v2  ;;  %v342_v7 = vld [vmem:[%s1066_s1 + $0x170] sm:$0xff]  ;;  %v341_v11 = vld [vmem:[%s1066_s1 + $0x168] sm:$0xff]  ;;  %s286_s26 = scalar_lea.vmem %s1069_s4, %s651_s22 }
  0x10   : > { %697 = vmatpush3.msra.mxu1 %v343_v3  ;;  %660 = vmatprep.subr.mxu0 %v326_v4  ;;  %v324_v12 = vld [vmem:[%s1066_s1 + $0xe0] sm:$0xff]  ;;  %v323_v16 = vld [vmem:[%s1066_s1 + $0xd8] sm:$0xff]  ;;  %v322_v20 = vld [vmem:[%s1066_s1 + $0xd0] sm:$0xff] }
  0x11   : > { %698 = vmatprep.subr.mxu1 %v358_v5  ;;  %661 = vmatpush3.msra.mxu0 %v310_v6  ;;  %v356_v13 = vld [vmem:[%s1066_s1 + $0x1e0] sm:$0xff]  ;;  %v355_v17 = vld [vmem:[%s1066_s1 + $0x1d8] sm:$0xff]  ;;  %v354_v21 = vld [vmem:[%s1066_s1 + $0x1d0] sm:$0xff] }
  0x12   : > { %699 = vmatpush3.msra.mxu1 %v342_v7  ;;  %662 = vmatprep.subr.mxu0 %v325_v8  ;;  %v308_v14 = vld [vmem:[%s1066_s1 + $0x60] sm:$0xff]  ;;  %v307_v18 = vld [vmem:[%s1066_s1 + $0x58] sm:$0xff]  ;;  %v306_v22 = vld [vmem:[%s1066_s1 + $0x50] sm:$0xff] }
  0x13   : > { %700 = vmatprep.subr.mxu1 %v357_v9  ;;  %v340_v15 = vld [vmem:[%s1066_s1 + $0x160] sm:$0xff]  ;;  %663 = vmatpush3.msra.mxu0 %v309_v10  ;;  %v339_v19 = vld [vmem:[%s1066_s1 + $0x158] sm:$0xff]  ;;  %v338_v23 = vld [vmem:[%s1066_s1 + $0x150] sm:$0xff] }
  0x14   : > { %701 = vmatpush3.msra.mxu1 %v341_v11  ;;  %664 = vmatprep.subr.mxu0 %v324_v12  ;;  %v321_v24 = vld [vmem:[%s1066_s1 + $0xc8] sm:$0xff]  ;;  %v320_v28 = vld [vmem:[%s1066_s1 + $0xc0] sm:$0xff]  ;;  %v319_v32 = vld [vmem:[%s1066_s1 + $0xb8] sm:$0xff] }
  0x15   : > { %702 = vmatprep.subr.mxu1 %v356_v13  ;;  %665 = vmatpush3.msra.mxu0 %v308_v14  ;;  %v353_v25 = vld [vmem:[%s1066_s1 + $0x1c8] sm:$0xff]  ;;  %v352_v29 = vld [vmem:[%s1066_s1 + $0x1c0] sm:$0xff]  ;;  %v351_v33 = vld [vmem:[%s1066_s1 + $0x1b8] sm:$0xff] }
  0x16   : > { %703 = vmatpush3.msra.mxu1 %v340_v15  ;;  %666 = vmatprep.subr.mxu0 %v323_v16  ;;  %v305_v26 = vld [vmem:[%s1066_s1 + $0x48] sm:$0xff]  ;;  %v304_v30 = vld [vmem:[%s1066_s1 + $0x40] sm:$0xff]  ;;  %v303_v34 = vld [vmem:[%s1066_s1 + $0x38] sm:$0xff] }
  0x17   : > { %704 = vmatprep.subr.mxu1 %v355_v17  ;;  %667 = vmatpush3.msra.mxu0 %v307_v18  ;;  %v337_v27 = vld [vmem:[%s1066_s1 + $0x148] sm:$0xff]  ;;  %v336_v31 = vld [vmem:[%s1066_s1 + $0x140] sm:$0xff]  ;;  %v335_v35 = vld [vmem:[%s1066_s1 + $0x138] sm:$0xff] }
  0x18   : > { %705 = vmatpush3.msra.mxu1 %v339_v19  ;;  %668 = vmatprep.subr.mxu0 %v322_v20  ;;  %v318_v36 = vld [vmem:[%s1066_s1 + $0xb0] sm:$0xff]  ;;  %v317_v40 = vld [vmem:[%s1066_s1 + $0xa8] sm:$0xff]  ;;  %v316_v44 = vld [vmem:[%s1066_s1 + $0xa0] sm:$0xff] }
  0x19   : > { %706 = vmatprep.subr.mxu1 %v354_v21  ;;  %669 = vmatpush3.msra.mxu0 %v306_v22  ;;  %v350_v37 = vld [vmem:[%s1066_s1 + $0x1b0] sm:$0xff]  ;;  %v349_v41 = vld [vmem:[%s1066_s1 + $0x1a8] sm:$0xff]  ;;  %v348_v45 = vld [vmem:[%s1066_s1 + $0x1a0] sm:$0xff] }
  0x1a   : > { %707 = vmatpush3.msra.mxu1 %v338_v23  ;;  %670 = vmatprep.subr.mxu0 %v321_v24  ;;  %v302_v38 = vld [vmem:[%s1066_s1 + $0x30] sm:$0xff]  ;;  %v301_v42 = vld [vmem:[%s1066_s1 + $0x28] sm:$0xff]  ;;  %v300_v46 = vld [vmem:[%s1066_s1 + $0x20] sm:$0xff] }
  0x1b   : > { %708 = vmatprep.subr.mxu1 %v353_v25  ;;  %671 = vmatpush3.msra.mxu0 %v305_v26  ;;  %v334_v39 = vld [vmem:[%s1066_s1 + $0x130] sm:$0xff]  ;;  %v333_v43 = vld [vmem:[%s1066_s1 + $0x128] sm:$0xff]  ;;  %v332_v47 = vld [vmem:[%s1066_s1 + $0x120] sm:$0xff] }
  0x1c   : > { %709 = vmatpush3.msra.mxu1 %v337_v27  ;;  %672 = vmatprep.subr.mxu0 %v320_v28  ;;  %v315_v48 = vld [vmem:[%s1066_s1 + $0x98] sm:$0xff]  ;;  %v314_v52 = vld [vmem:[%s1066_s1 + $0x90] sm:$0xff]  ;;  %v313_v56 = vld [vmem:[%s1066_s1 + $0x88] sm:$0xff] }
  0x1d   : > { %710 = vmatprep.subr.mxu1 %v352_v29  ;;  %673 = vmatpush3.msra.mxu0 %v304_v30  ;;  %v347_v49 = vld [vmem:[%s1066_s1 + $0x198] sm:$0xff]  ;;  %v346_v53 = vld [vmem:[%s1066_s1 + $0x190] sm:$0xff]  ;;  %v345_v57 = vld [vmem:[%s1066_s1 + $0x188] sm:$0xff] }
  0x1e   : > { %711 = vmatpush3.msra.mxu1 %v336_v31  ;;  %674 = vmatprep.subr.mxu0 %v319_v32  ;;  %v299_v50 = vld [vmem:[%s1066_s1 + $0x18] sm:$0xff]  ;;  %v298_v54 = vld [vmem:[%s1066_s1 + $0x10] sm:$0xff]  ;;  %v297_v58 = vld [vmem:[%s1066_s1 + $0x8] sm:$0xff] }
  0x1f   : > { %712 = vmatprep.subr.mxu1 %v351_v33  ;;  %675 = vmatpush3.msra.mxu0 %v303_v34  ;;  %v331_v51 = vld [vmem:[%s1066_s1 + $0x118] sm:$0xff]  ;;  %v330_v55 = vld [vmem:[%s1066_s1 + $0x110] sm:$0xff]  ;;  %v329_v59 = vld [vmem:[%s1066_s1 + $0x108] sm:$0xff] }
  0x20   : > { %713 = vmatpush3.msra.mxu1 %v335_v35  ;;  %676 = vmatprep.subr.mxu0 %v318_v36  ;;  %v312_v60 = vld [vmem:[%s1066_s1 + $0x80] sm:$0xff]  ;;  %v289_v63 = vld [vmem:[%s1018_s30 + $0x8] sm:$0xff]  ;;  %v291_v1 = vld [vmem:[%s1018_s30 + $0x18] sm:$0xff] }
  0x21   : > { %714 = vmatprep.subr.mxu1 %v350_v37  ;;  %677 = vmatpush3.msra.mxu0 %v302_v38  ;;  %v344_v61 = vld [vmem:[%s1066_s1 + $0x180] sm:$0xff]  ;;  %v290_v3 = vld [vmem:[%s1018_s30 + $0x10] sm:$0xff]  ;;  %v293_v4 = vld [vmem:[%s1018_s30 + $0x28] sm:$0xff] }
  0x22   : > { %715 = vmatpush3.msra.mxu1 %v334_v39  ;;  %678 = vmatprep.subr.mxu0 %v317_v40  ;;  %v296_v62 = vld [vmem:[%s1066_s1] sm:$0xff]  ;;  %v295_v5 = vld [vmem:[%s1018_s30 + $0x38] sm:$0xff]  ;;  %v294_v7 = vld [vmem:[%s1018_s30 + $0x30] sm:$0xff] }
  0x23   : > { %716 = vmatprep.subr.mxu1 %v349_v41  ;;  %679 = vmatpush3.msra.mxu0 %v301_v42  ;;  %v328_v0 = vld [vmem:[%s1066_s1 + $0x100] sm:$0xff]  ;;  %v518_v26 = vld [vmem:[%s277_s28 + $0x8] sm:$0xff] }
  0x24   : > { %717 = vmatpush3.msra.mxu1 %v333_v43  ;;  %680 = vmatprep.subr.mxu0 %v316_v44  ;;  %v288_v2 = vld [vmem:[%s1018_s30] sm:$0xff] }
  0x25   : > { %718 = vmatprep.subr.mxu1 %v348_v45  ;;  %681 = vmatpush3.msra.mxu0 %v300_v46  ;;  %v292_v6 = vld [vmem:[%s1018_s30 + $0x20] sm:$0xff] }
  0x26   : > { %719 = vmatpush3.msra.mxu1 %v332_v47  ;;  %682 = vmatprep.subr.mxu0 %v315_v48  ;;  %v654_v10 = vld [vmem:[%s1067_s2] ss:$0 sm:$0xff] }
  0x27   : > { %720 = vmatprep.subr.mxu1 %v347_v49  ;;  %683 = vmatpush3.msra.mxu0 %v299_v50  ;;  %v517_v18 = vld [vmem:[%s277_s28] sm:$0xff] }
  0x28   : > { %721 = vmatpush3.msra.mxu1 %v331_v51  ;;  %684 = vmatprep.subr.mxu0 %v314_v52 }
  0x29   : > { %722 = vmatprep.subr.mxu1 %v346_v53  ;;  %685 = vmatpush3.msra.mxu0 %v298_v54 }
  0x2a   : > { %723 = vmatpush3.msra.mxu1 %v330_v55  ;;  %686 = vmatprep.subr.mxu0 %v313_v56 }
  0x2b   : > { %724 = vmatprep.subr.mxu1 %v345_v57  ;;  %687 = vmatpush3.msra.mxu0 %v297_v58 }
  0x2c   : > { %725 = vmatpush3.msra.mxu1 %v329_v59  ;;  %688 = vmatprep.subr.mxu0 %v312_v60 }
  0x2d   : > { %726 = vmatprep.subr.mxu1 %v344_v61  ;;  %689 = vmatpush3.msra.mxu0 %v296_v62 }
  0x2e   : > { %431 = vmatprep.mubr.f32.mxu0 %v289_v63  ;;  %727 = vmatpush3.msra.mxu1 %v328_v0 }
  0x2f   : > { %506 = vmatprep.mubr.f32.mxu1 %v291_v1  ;;  %432 = vmatmul.mubr.f32.vlgmr.msra.gmra.mxu0 %v288_v2 }
  0x30   : > { %507 = vmatmul.mubr.f32.vlgmr.msra.gmra.mxu1 %v290_v3  ;;  %436 = vmatprep.mubr.f32.mxu0 %v293_v4 }
  0x31   : > { %511 = vmatprep.mubr.f32.mxu1 %v295_v5 }
  0x33   : > { %437 = vmatmul.mubr.f32.gmra.mxu0 %v292_v6 }
  0x34   : > { %512 = vmatmul.mubr.f32.gmra.mxu1 %v294_v7 }
  0xef   : > { %v690_v8 = vpop.f32.mrf.mxu0 }
  0xf0   : > { %v728_v9 = vpop.f32.mrf.mxu1 }
  0xf1   : > { %v691_v11 = vpop.f32.mrf.mxu0 }
  0xf2   : > { %v729_v12 = vpop.f32.mrf.mxu1  ;;  %v692_v13 = vadd.f32 %v691_v11, %v690_v8 }
  0xf3   : > { %v693_v14 = vpop.f32.mrf.mxu0  ;;  %v730_v17 = vadd.f32 %v729_v12, %v728_v9 }
  0xf4   : > { %v731_v15 = vpop.f32.mrf.mxu1  ;;  %v434_v16 = vadd.f32 %v692_v13, %v654_v10 }
  0xf5   : > { %v694_v19 = vpop.f32.mrf.mxu0 }
  0xf6   : > { %v732_v20 = vpop.f32.mrf.mxu1  ;;  %v509_v21 = vadd.f32 %v730_v17, %v434_v16  ;;  %v695_v22 = vadd.f32 %v694_v19, %v693_v14 }
  0xf7   : > { %v733_v25 = vadd.f32 %v732_v20, %v731_v15 }
  0xf8   : > { %v519_v23 = vadd.f32 %v517_v18, %v509_v21  ;;  %v439_v24 = vadd.f32 %v695_v22, %v654_v10 }
  0xfa   : > { %521 = vst [vmem:[%s286_s26] sm:$0xff] %v519_v23  ;;  %v514_v27 = vadd.f32 %v733_v25, %v439_v24 }
  0xfc   : > { %v520_v28 = vadd.f32 %v518_v26, %v514_v27 }
  0xfe   : > { %522 = vst [vmem:[%s286_s26 + $0x8] sm:$0xff] %v520_v28 }
  0xff PF: > { %s14_s17 = sadd.s32 1, %s780_s17   ;;  %s1071_s15 = smov %s776_s16 }
 0x100   : > { %p11_p5 = scmp.ge.s32.totalorder %s14_s17, 4   ;;  %s1072_s16 = smov %s1074_s18 }
 0x102   :  { %13 = sbr.rel (!%p11_p5) target bundleno = 2 (0x2), region = 75 }

// kernel: idefics2_encoder_layer.5
= control target key start
LH: loop header
LB: loop body
LE: loop exit
PB: predicated region body
PF: predicated region fallthrough
CT: control target
= control target key end

     0   :  { %s1318_s0 = inlined_call_operand.vmem [shape: f32[2,16,1536], index: 0, kind: input, shape index: {}, may-alias: {0,1,2}]   ;;  %s1319_s1 = inlined_call_operand.vmem [shape: f32[2,16,1536], index: 1, kind: input, shape index: {}, may-alias: {0,1,2}]   ;;  %s1320_s2 = inlined_call_operand.vmem [shape: f32[2,16,1536], index: 2, kind: input, shape index: {}, may-alias: {0,1,2}]   ;;  %s1321_s3 = inlined_call_operand.vmem [shape: f32[2,16,512], index: 3, kind: output, shape index: {}]  }
   0x1   :  { %1324 = sst [smem:[#allocation10_spill]] %s1321_s3 }
   0x2   :  { %s1098_s12 = smov 0   ;;  %s1100_s13 = smov 0  }
   0x3   :  { %s1102_s14 = smov 0   ;;  %s1104_s15 = smov 0  }
   0x4   :  { %s1106_s16 = smov 0   ;;  %s1108_s17 = smov 0  }
   0x5   :  { %s1110_s18 = smov 0   ;;  %s1112_s19 = smov 0  }
   0x6   :  { %s1114_s20 = smov 0   ;;  %s1116_s21 = smov 0  }
   0x7   :  { %s1118_s22 = smov 0  }
   0x8 LB: > { %s28_s24 = sadd.s32 1, %s1068_s20  ;;  %s32_s25 = sadd.s32 1, %s1072_s21  ;;  %s1076_s22 = sphi %s1118_s22, %s13_s22   ;;  %s1072_s21 = sphi %s1116_s21, %s1346_s21   ;;  %s1068_s20 = sphi %s1114_s20, %s1345_s20   ;;  %s1064_s19 = sphi %s1112_s19, %s1344_s19   ;;  %s1060_s18 = sphi %s1110_s18, %s1343_s18   ;;  %s1056_s17 = sphi %s1108_s17, %s1342_s17   ;;  %s1052_s16 = sphi %s1106_s16, %s1341_s16   ;;  %s1048_s15 = sphi %s1104_s15, %s1340_s15   ;;  %s1044_s14 = sphi %s1102_s14, %s1339_s14   ;;  %s1040_s13 = sphi %s1100_s13, %s1338_s13   ;;  %s1036_s12 = sphi %s1098_s12, %s1337_s12  }
   0x9   : > { %p30_p0 = scmp.ge.s32.totalorder %s28_s24, 4  ;;  %s43_s26 = sadd.s32 1, %s1056_s17 }
   0xa   : > { %p50_p1 = scmp.ne.s32.totalorder %s1056_s17, %s1052_s16  ;;  %p51_p2 = scmp.eq.s32.totalorder %s1076_s22, 0 }
   0xb   : > { %s1348_s24 = smov (%p30_p0, %s28_s24), 0  ;;  %s1350_s25 = smov (!%p30_p0, %s32_s25), %s1072_s21 }
   0xc   : > { %1325 = sst [smem:[#allocation7_spill]] %s1348_s24  ;;  %s39_s27 = ssub.s32 %s1068_s20, %s1348_s24 }
   0xd   : > { %p34_p3 = scmp.ge.s32.totalorder %s1350_s25, 2  ;;  %s66_s28 = sadd.s32 4, %s1068_s20 }
   0xe   : > { %p1171_p4 = por %p51_p2, %p50_p1  ;;  %s67_s30 = sadd.s32 4, %s1348_s24 }
   0xf   : > { %s1352_s25 = smov (%p34_p3, %s1350_s25), 0  ;;  %s69_s4 = ssub.s32 %s66_s28, %s67_s30 }
  0x10   : > { %1327 = sst [smem:[#allocation8_spill]] %s1352_s25  ;;  %s73_s5 = sadd.s32 1, %s1048_s15 }
  0x11   : > { %s36_s6 = ssub.s32 %s1072_s21, %s1352_s25  ;;  %p80_p5 = scmp.ne.s32.totalorder %s1048_s15, %s1044_s14 }
  0x12   : > { %s40_s7 = sor.u32 %s39_s27, %s36_s6  ;;  %s70_s8 = sor.u32 %s69_s4, %s36_s6 }
  0x13   : > { %p41_p6 = scmp.eq.s32.totalorder %s40_s7, 0  ;;  %p71_p7 = scmp.eq.s32.totalorder %s70_s8, 0 }
  0x14   : > { %p1185_p8 = por %p80_p5, %p51_p2  ;;  %s96_s10 = sadd.s32 8, %s1068_s20 }
  0x15   : > { %s1191_s11 = scalar_select %p41_p6, %s1056_s17, %s43_s26  }
  0x16   : > { %s1194_s28 = scalar_select %p71_p7, %s1048_s15, %s73_s5  }
  0x17   : > { %1329 = sst [smem:[#allocation9_spill]] %s1191_s11  ;;  %s97_s30 = sadd.s32 8, %s1348_s24 }
  0x18   : > { %s103_s23 = sadd.s32 1, %s1040_s13  ;;  %s99_s25 = ssub.s32 %s96_s10, %s97_s30 }
  0x19   : > { %p110_p9 = scmp.ne.s32.totalorder %s1040_s13, %s1036_s12  ;;  %s100_s27 = sor.u32 %s99_s25, %s36_s6 }
  0x1a   : > { %s1330_s3 = sadd.s32 4294967295, %s1076_s22   ;;  %p101_p11 = scmp.eq.s32.totalorder %s100_s27, 0 }
  0x1b   : > { %p144_p10 = scmp.eq.s32.totalorder %s1330_s3, 7  ;;  %p1204_p12 = por %p110_p9, %p51_p2 }
  0x1c   : > { %s1216_s26 = scalar_select %p101_p11, %s1040_s13, %s103_s23  }
  0x1d   : > { %p1211_p13 = por %p144_p10, %p50_p1  ;;  %p805_p0 = scmp.ge.s32.totalorder %s1076_s22, 8 }
  0x1f   : > { %166 = sbr.rel (%p805_p0) target bundleno = 63 (0x3f), region = 16 }
  0x24   : > { %169 = sbr.rel (!%p1171_p4) target bundleno = 45 (0x2d), region = 20  ;;  %s171_s3 = sand.u32 (%p1171_p4), 1, %s1056_s17  }
  0x25   : > { %s892_s25 = smul.u32 (%p1171_p4), 24, %s1072_s21  ;;  %s806_s5 = sshll.u32 (%p1171_p4), %s171_s3, 4 }
  0x26   : > { %s173_s23 = scalar_lea.vmem (%p1171_p4), [#allocation3], %s806_s5 }
  0x27   : > { %s178_s6 = sadd.s32 (%p1171_p4), %s1068_s20, %s892_s25 }
  0x28   : > { %s807_s8 = sshll.u32 (%p1171_p4), %s178_s6, 3 }
  0x29   : > { %s180_s27 = scalar_lea.vmem %s1318_s0, %s807_s8 }
  0x2a   : > { %v211_v0 = vld [vmem:[%s180_s27] sm:$0xff] }
  0x2b   : > { %v213_v1 = vld [vmem:[%s180_s27 + $0x60] sm:$0xff]  ;;  %212 = vst [vmem:[%s173_s23] sm:$0xff] %v211_v0 }
  0x2c   : > { %214 = vst [vmem:[%s173_s23 + $0x8] sm:$0xff] %v213_v1 }
  0x2d PF: > { %220 = sbr.rel (!%p1185_p8) target bundleno = 54 (0x36), region = 58  ;;  %s222_s29 = sand.u32 (%p1185_p8), 1, %s1048_s15  }
  0x2e   : > { %s703_s3 = smul.u32 (%p1185_p8), 24, %s1072_s21  ;;  %s808_s25 = sshll.u32 (%p1185_p8), %s222_s29, 4 }
  0x2f   : > { %s224_s5 = scalar_lea.vmem (%p1185_p8), [#allocation4], %s808_s25 }
  0x30   : > { %s704_s6 = sadd.s32 (%p1185_p8), %s1068_s20, %s703_s3 }
  0x31   : > { %s809_s24 = sshll.u32 (%p1185_p8), %s704_s6, 3 }
  0x32   : > { %s706_s8 = scalar_lea.vmem %s1319_s1, %s809_s24 }
  0x33   : > { %v810_v2 = vld [vmem:[%s706_s8 + $0x20] sm:$0xff] }
  0x34   : > { %v811_v3 = vld [vmem:[%s706_s8 + $0x80] sm:$0xff]  ;;  %261 = vst [vmem:[%s224_s5] sm:$0xff] %v810_v2 }
  0x35   : > { %263 = vst [vmem:[%s224_s5 + $0x8] sm:$0xff] %v811_v3 }
  0x36 PF: > { %269 = sbr.rel (!%p1204_p12) target bundleno = 63 (0x3f), region = 96  ;;  %s271_s9 = sand.u32 (%p1204_p12), 1, %s1040_s13  }
  0x37   : > { %s710_s30 = smul.u32 (%p1204_p12), 24, %s1072_s21  ;;  %s812_s27 = sshll.u32 (%p1204_p12), %s271_s9, 4 }
  0x38   : > { %s273_s25 = scalar_lea.vmem (%p1204_p12), [#allocation5], %s812_s27 }
  0x39   : > { %s711_s23 = sadd.s32 (%p1204_p12), %s1068_s20, %s710_s30 }
  0x3a   : > { %s813_s29 = sshll.u32 (%p1204_p12), %s711_s23, 3 }
  0x3b   : > { %s713_s24 = scalar_lea.vmem %s1320_s2, %s813_s29 }
  0x3c   : > { %v814_v4 = vld [vmem:[%s713_s24 + $0x40] sm:$0xff] }
  0x3d   : > { %v815_v5 = vld [vmem:[%s713_s24 + $0xa0] sm:$0xff]  ;;  %310 = vst [vmem:[%s273_s25] sm:$0xff] %v814_v4 }
  0x3e   : > { %312 = vst [vmem:[%s273_s25 + $0x8] sm:$0xff] %v815_v5 }
  0x3f PF: > { %p816_p1 = scmp.ge.s32.totalorder %s1076_s22, 1  ;;  %p317_p2 = scmp.lt.s32.totalorder %s1076_s22, 9 }
  0x41   : > { %p318_p3 = pnand %p816_p1, %p317_p2 }
  0x42   : > { %s331_s4 = sand.u32 (!%p318_p3), 1, %s1044_s14   ;;  %s324_s8 = sand.u32 (!%p318_p3), 1, %s1052_s16  }
  0x43   : > { %321 = sbr.rel (%p318_p3) target bundleno = 860 (0x35c), region = 134  ;;  %s818_s6 = sshll.u32 (!%p318_p3), %s331_s4, 4 }
  0x44   : > { %s333_s10 = scalar_lea.vmem (!%p318_p3), [#allocation4], %s818_s6  ;;  %s1247_s5 = sshll.u32 (!%p318_p3), %s324_s8, 4 }
  0x45   : > { %s326_s9 = scalar_lea.vmem (!%p318_p3), [#allocation3], %s1247_s5  ;;  %s338_s14 = sand.u32 (!%p318_p3), 1, %s1036_s12  }
  0x46   : > { %s819_s16 = sshll.u32 (!%p318_p3), %s338_s14, 4  ;;  %s367_s12 = scalar_lea.vmem (!%p318_p3), [#allocation6], %s1247_s5 }
  0x47   : > { %s340_s30 = scalar_lea.vmem (!%p318_p3), [#allocation5], %s819_s16 }
  0x48   : > { %v376_v6 = vld [vmem:[%s333_s10] sm:$0xff]  ;;  %v377_v7 = vld [vmem:[%s333_s10 + $0x8] sm:$0xff]  ;;  %vm410_vm0 = vcmask 130048   ;;  %s824_s27 = sshll.u32 (%p1211_p13), %s1064_s19, 3  ;;  %s1333_s24 = sld [smem:[#allocation10_spill]] (%p1211_p13) }
  0x49   : > { %378 = vxpose.xlu0.b32.start [1/2] (short) %v376_v6, 128  ;;  %v427_v8 = vld [vmem:[%s326_s9] sm:$0xff]  ;;  %v428_v40 = vld [vmem:[%s326_s9 + $0x8] sm:$0xff]  ;;  %s641_s23 = sadd.s32 (%p1211_p13), %s1060_s18, %s824_s27 }
  0x4a   : > { %v429_v9 = vmul.f32 0.17677669, %v427_v8  ;;  %v430_v42 = vmul.f32 0.17677669, %v428_v40  ;;  %v542_v48 = vld [vmem:[%s340_s30 + $0x8] sm:$0xff]  ;;  %v541_v49 = vld [vmem:[%s340_s30] sm:$0xff] }
  0x4b   : > { %885 = vmatprep.subr.mxu1 %v542_v48  ;;  %s825_s29 = sshll.u32 (%p1211_p13), %s641_s23, 3 }
  0x4c   : > { %882 = vmatprep.mubr.f32.mxu0 %v429_v9  ;;  %886 = vmatpush3.msra.mxu1 %v542_v48 }
  0x4d   : > { %379 = vxpose.xlu0.b32.end [2/2] (short) %v377_v7, 128  ;;  %887 = vmatprep.subr.mxu1 %v541_v49 }
  0x4e   : > { %888 = vmatpush3.msra.mxu1 %v541_v49  ;;  %s643_s25 = scalar_lea.vmem (%p1211_p13), %s1333_s24, %s825_s29 }
  0xc5   : > { %v394_v10 = vpop.trf.xlu0 }
  0xc6   : > { %411 = vst.msk [vmem:[#allocation2] sm:$0xff] %vm410_vm0, %v394_v10 }
  0xc9   : > { %v395_v11 = vpop.trf.xlu0 }
  0xca   : > { %412 = vst.msk [vmem:[#allocation2 + $0x8] sm:$0xff] %vm410_vm0, %v395_v11 }
  0xcd   : > { %v396_v12 = vpop.trf.xlu0  ;;  %v431_v43 = vld [vmem:[#allocation2] sm:$0xff] }
  0xce   : > { %413 = vst.msk [vmem:[#allocation2 + $0x10] sm:$0xff] %vm410_vm0, %v396_v12 }
  0xd1   : > { %v397_v13 = vpop.trf.xlu0  ;;  %v432_v41 = vld [vmem:[#allocation2 + $0x8] sm:$0xff] }
  0xd2   : > { %414 = vst.msk [vmem:[#allocation2 + $0x18] sm:$0xff] %vm410_vm0, %v397_v13 }
  0xd5   : > { %v398_v14 = vpop.trf.xlu0  ;;  %v433_v39 = vld [vmem:[#allocation2 + $0x10] sm:$0xff] }
  0xd6   : > { %415 = vst.msk [vmem:[#allocation2 + $0x20] sm:$0xff] %vm410_vm0, %v398_v14 }
  0xd9   : > { %v399_v15 = vpop.trf.xlu0  ;;  %v434_v38 = vld [vmem:[#allocation2 + $0x18] sm:$0xff] }
  0xda   : > { %416 = vst.msk [vmem:[#allocation2 + $0x28] sm:$0xff] %vm410_vm0, %v399_v15 }
  0xdd   : > { %v400_v16 = vpop.trf.xlu0  ;;  %v435_v37 = vld [vmem:[#allocation2 + $0x20] sm:$0xff] }
  0xde   : > { %417 = vst.msk [vmem:[#allocation2 + $0x30] sm:$0xff] %vm410_vm0, %v400_v16 }
  0xe1   : > { %v401_v17 = vpop.trf.xlu0  ;;  %v436_v36 = vld [vmem:[#allocation2 + $0x28] sm:$0xff] }
  0xe2   : > { %418 = vst.msk [vmem:[#allocation2 + $0x38] sm:$0xff] %vm410_vm0, %v401_v17 }
  0xe5   : > { %v402_v18 = vpop.trf.xlu0  ;;  %v437_v35 = vld [vmem:[#allocation2 + $0x30] sm:$0xff] }
  0xe6   : > { %419 = vst.msk [vmem:[#allocation2 + $0x40] sm:$0xff] %vm410_vm0, %v402_v18 }
  0xe9   : > { %v403_v19 = vpop.trf.xlu0  ;;  %v438_v34 = vld [vmem:[#allocation2 + $0x38] sm:$0xff] }
  0xea   : > { %420 = vst.msk [vmem:[#allocation2 + $0x48] sm:$0xff] %vm410_vm0, %v403_v19 }
  0xed   : > { %v404_v20 = vpop.trf.xlu0  ;;  %v439_v33 = vld [vmem:[#allocation2 + $0x40] sm:$0xff] }
  0xee   : > { %421 = vst.msk [vmem:[#allocation2 + $0x50] sm:$0xff] %vm410_vm0, %v404_v20 }
  0xf1   : > { %v405_v21 = vpop.trf.xlu0  ;;  %v440_v32 = vld [vmem:[#allocation2 + $0x48] sm:$0xff] }
  0xf2   : > { %422 = vst.msk [vmem:[#allocation2 + $0x58] sm:$0xff] %vm410_vm0, %v405_v21 }
  0xf5   : > { %v406_v22 = vpop.trf.xlu0  ;;  %v441_v31 = vld [vmem:[#allocation2 + $0x50] sm:$0xff] }
  0xf6   : > { %423 = vst.msk [vmem:[#allocation2 + $0x60] sm:$0xff] %vm410_vm0, %v406_v22 }
  0xf9   : > { %v407_v23 = vpop.trf.xlu0  ;;  %v442_v30 = vld [vmem:[#allocation2 + $0x58] sm:$0xff] }
  0xfa   : > { %424 = vst.msk [vmem:[#allocation2 + $0x68] sm:$0xff] %vm410_vm0, %v407_v23 }
  0xfd   : > { %v408_v24 = vpop.trf.xlu0  ;;  %v443_v29 = vld [vmem:[#allocation2 + $0x60] sm:$0xff] }
  0xfe   : > { %425 = vst.msk [vmem:[#allocation2 + $0x70] sm:$0xff] %vm410_vm0, %v408_v24 }
 0x101   : > { %v409_v25 = vpop.trf.xlu0  ;;  %v444_v28 = vld [vmem:[#allocation2 + $0x68] sm:$0xff] }
 0x102   : > { %426 = vst.msk [vmem:[#allocation2 + $0x78] sm:$0xff] %vm410_vm0, %v409_v25 }
 0x105   : > { %v445_v27 = vld [vmem:[#allocation2 + $0x70] sm:$0xff] }
 0x109   : > { %v446_v26 = vld [vmem:[#allocation2 + $0x78] sm:$0xff] }
 0x10a   : > { %850 = vmatprep.subr.mxu0 %v446_v26 }
 0x10b   : > { %851 = vmatpush3.msra.mxu0 %v446_v26 }
 0x10c   : > { %852 = vmatprep.subr.mxu0 %v445_v27 }
 0x10d   : > { %853 = vmatpush3.msra.mxu0 %v445_v27 }
 0x10e   : > { %854 = vmatprep.subr.mxu0 %v444_v28 }
 0x10f   : > { %855 = vmatpush3.msra.mxu0 %v444_v28 }
 0x110   : > { %856 = vmatprep.subr.mxu0 %v443_v29 }
 0x111   : > { %857 = vmatpush3.msra.mxu0 %v443_v29 }
 0x112   : > { %858 = vmatprep.subr.mxu0 %v442_v30 }
 0x113   : > { %859 = vmatpush3.msra.mxu0 %v442_v30 }
 0x114   : > { %860 = vmatprep.subr.mxu0 %v441_v31 }
 0x115   : > { %861 = vmatpush3.msra.mxu0 %v441_v31 }
 0x116   : > { %862 = vmatprep.subr.mxu0 %v440_v32 }
 0x117   : > { %863 = vmatpush3.msra.mxu0 %v440_v32 }
 0x118   : > { %864 = vmatprep.subr.mxu0 %v439_v33 }
 0x119   : > { %865 = vmatpush3.msra.mxu0 %v439_v33 }
 0x11a   : > { %866 = vmatprep.subr.mxu0 %v438_v34 }
 0x11b   : > { %867 = vmatpush3.msra.mxu0 %v438_v34 }
 0x11c   : > { %868 = vmatprep.subr.mxu0 %v437_v35 }
 0x11d   : > { %869 = vmatpush3.msra.mxu0 %v437_v35 }
 0x11e   : > { %870 = vmatprep.subr.mxu0 %v436_v36 }
 0x11f   : > { %871 = vmatpush3.msra.mxu0 %v436_v36 }
 0x120   : > { %872 = vmatprep.subr.mxu0 %v435_v37 }
 0x121   : > { %873 = vmatpush3.msra.mxu0 %v435_v37 }
 0x122   : > { %874 = vmatprep.subr.mxu0 %v434_v38 }
 0x123   : > { %875 = vmatpush3.msra.mxu0 %v434_v38 }
 0x124   : > { %876 = vmatprep.subr.mxu0 %v433_v39 }
 0x125   : > { %877 = vmatpush3.msra.mxu0 %v433_v39 }
 0x126   : > { %878 = vmatprep.subr.mxu0 %v432_v41 }
 0x127   : > { %879 = vmatpush3.msra.mxu0 %v432_v41 }
 0x128   : > { %880 = vmatprep.subr.mxu0 %v431_v43 }
 0x129   : > { %881 = vmatpush3.msra.mxu0 %v431_v43 }
 0x12a   : > { %883 = vmatmul.mubr.f32.vlgmr.msra.gmra.mxu0 %v430_v42 }
 0x1ea   : > { %v884_v44 = vpop.f32.mrf.mxu0 }
 0x1eb   : > { %v526_v47 = vsel %vm410_vm0, %v884_v44, -inf }
 0x1ec   : > { %v513_v45 = vpop.f32.mrf.mxu0 }
 0x1ed   : > { %v523_v46 = vsel %vm410_vm0, %v513_v45, -inf }
 0x1ee   : > { %524 = vmax.xlane.f32.xlu1 %v523_v46 }
 0x1f2   : > { %527 = vmax.xlane.f32.xlu1 %v526_v47 }
 0x277   : > { %v525_v50 = vpop.xlane.xlu1 %524 }
 0x278   : > { %v529_v51 = vsub.f32 %v513_v45, %v525_v50 }
 0x27a   : > { %v531_v52 = vmul.f32 1.442695, %v529_v51 }
 0x27b   : > { %v528_v53 = vpop.xlane.xlu1 %527 }
 0x27c   : > { %982 = vpow2.f32 %v531_v52  ;;  %v530_v54 = vsub.f32 %v884_v44, %v528_v53 }
 0x27e   : > { %v533_v55 = vmul.f32 1.442695, %v530_v54 }
 0x280   : > { %984 = vpow2.f32 %v533_v55 }
 0x289   : > { %v983_v56 = vpop.eup %982 }
 0x28a   : > { %889 = vmatprep.mubr.msk.f32.mxu1 %vm410_vm0, %v983_v56  ;;  %v535_v57 = vsel %vm410_vm0, %v983_v56, 0.0 }
 0x28b   : > { %536 = vadd.xlane.f32.xlu0 %v535_v57 }
 0x28d   : > { %v985_v58 = vpop.eup %984 }
 0x28e   : > { %890 = vmatmul.mubr.msk.f32.vlgmr.msra.gmra.mxu1 %vm410_vm0, %v985_v58  ;;  %v538_v59 = vsel %vm410_vm0, %v985_v58, 0.0 }
 0x28f   : > { %539 = vadd.xlane.f32.xlu1 %v538_v59 }
 0x314   : > { %v537_v61 = vpop.xlane.xlu0 %536 }
 0x318   : > { %v540_v60 = vpop.xlane.xlu1 %539 }
 0x319   : > { %986 = vrcp.f32 %v540_v60 }
 0x31a   : > { %988 = vrcp.f32 %v537_v61 }
 0x326   : > { %v987_v62 = vpop.eup %986 }
 0x327   : > { %v989_v1 = vpop.eup %988 }
 0x34e   : > { %v891_v63 = vpop.f32.mrf.mxu1 }
 0x34f   : > { %v627_v0 = vmul.f32 %v987_v62, %v891_v63  ;;  %636 = sbr.rel (!%p1211_p13) target bundleno = 860 (0x35c), region = 154 }
 0x350   : > { %v615_v2 = vpop.f32.mrf.mxu1 }
 0x351   : > { %629 = vst [vmem:[%s367_s12 + $0x8] sm:$0xff] %v627_v0  ;;  %v626_v3 = vmul.f32 %v989_v1, %v615_v2 }
 0x353   : > { %628 = vst [vmem:[%s367_s12] sm:$0xff] %v626_v3 }
 0x358   : > { %v676_v5 = vld [vmem:[%s367_s12 + $0x8] sm:$0xff] }
 0x359   : > { %677 = vst [vmem:[%s643_s25 + $0x20] sm:$0xff] %v676_v5 }
 0x35a   : > { %v674_v4 = vld [vmem:[%s367_s12] sm:$0xff] }
 0x35b   : > { %675 = vst [vmem:[%s643_s25] sm:$0xff] %v674_v4 }
 0x35c PF: > { %s13_s22 = sadd.s32 1, %s1076_s22   ;;  %s1334_s18 = sld [smem:[#allocation9_spill]] }
 0x35d   : > { %p10_p4 = scmp.ge.s32.totalorder %s13_s22, 10   ;;  %s1335_s7 = sld [smem:[#allocation7_spill]] }
 0x35e   : > { %s1336_s4 = sld [smem:[#allocation8_spill]]  ;;  %s1337_s12 = smov %s1040_s13 }
 0x35f   : > { %s1338_s13 = smov %s1216_s26  ;;  %s1339_s14 = smov %s1048_s15 }
 0x360   : > { %s1340_s15 = smov %s1194_s28  ;;  %s1341_s16 = smov %s1056_s17 }
 0x361   : > { %s1344_s19 = smov %s1072_s21  ;;  %12 = sbr.rel (!%p10_p4) target bundleno = 8 (0x8), region = 239 }
 0x362   : > { %s1342_s17 = smov %s1334_s18  ;;  %s1343_s18 = smov %s1068_s20 }
 0x363   : > { %s1345_s20 = smov %s1335_s7 }
 0x364   : > { %s1346_s21 = smov %s1336_s4 }

// kernel: idefics2_encoder_layer.4
= control target key start
LH: loop header
LB: loop body
LE: loop exit
PB: predicated region body
PF: predicated region fallthrough
CT: control target
= control target key end

     0   :  { %s1558_s0 = inlined_call_operand.hbm [shape: f32[32,128], index: 0, kind: input, shape index: {}]   ;;  %s1559_s1 = inlined_call_operand.vmem [shape: f32[1,128], index: 1, kind: input, shape index: {}]   ;;  %s1560_s2 = inlined_call_operand.vmem [shape: f32[1,128], index: 2, kind: input, shape index: {}]   ;;  %s1561_s3 = inlined_call_operand.hbm [shape: f32[128,1536], index: 3, kind: input, shape index: {}]   ;;  %s1562_s4 = inlined_call_operand.hbm [shape: f32[1,1536], index: 4, kind: input, shape index: {}]   ;;  %s1563_s5 = inlined_call_operand.vmem [shape: f32[32,1536], index: 5, kind: output, shape index: {}]  }
   0x1   :  { %1574 = sst [smem:[#allocation21_spill]] %s1558_s0 }
   0x2   :  { %1575 = sst [smem:[#allocation22_spill]] %s1559_s1 }
   0x3   :  { %1576 = sst [smem:[#allocation23_spill]] %s1560_s2 }
   0x4   :  { %1577 = sst [smem:[#allocation24_spill]] %s1561_s3 }
   0x5   :  { %1578 = sst [smem:[#allocation25_spill]] %s1563_s5 }
   0x6   :  { %10 = vsyncpa [#allocation4], 0 }
   0x7   :  { %12 = vsyncpa [#allocation4 + $0x1], 0 }
   0x8   :  { %13 = vsyncpa [#allocation6], 0 }
   0x9   :  { %15 = vsyncpa [#allocation6 + $0x1], 0  ;;  %s1193_s18 = smov 0   ;;  %s1195_s19 = smov 0  }
   0xa   :  { %s1197_s20 = smov 0   ;;  %s1199_s21 = smov 0  }
   0xb   :  { %s1201_s22 = smov 0   ;;  %s1203_s23 = smov 0  }
   0xc   :  { %s1205_s24 = smov 0   ;;  %s1207_s25 = smov 0  }
   0xd   :  { %s1209_s26 = smov 0   ;;  %s1211_s27 = smov 0  }
   0xe   :  { %s1213_s28 = smov 0   ;;  %s1215_s29 = smov 0  }
   0xf   :  { %s1217_s30 = smov 0  }
  0x10 LB: > { %1579 = sst [smem:[#allocation11_spill]] %s1116_s21  ;;  %s1564_s6 = sadd.s32 1, %s1144_s28  ;;  %s1152_s30 = sphi %s1217_s30, %s21_s30   ;;  %s1148_s29 = sphi %s1215_s29, %s1619_s29   ;;  %s1144_s28 = sphi %s1213_s28, %s1627_s28   ;;  %s1140_s27 = sphi %s1211_s27, %s1617_s27   ;;  %s1136_s26 = sphi %s1209_s26, %s1626_s26   ;;  %s1132_s25 = sphi %s1207_s25, %s1616_s25   ;;  %s1128_s24 = sphi %s1205_s24, %s1625_s24   ;;  %s1124_s23 = sphi %s1203_s23, %s1624_s23   ;;  %s1120_s22 = sphi %s1201_s22, %s1623_s22   ;;  %s1116_s21 = sphi %s1199_s21, %s1622_s21   ;;  %s1112_s20 = sphi %s1197_s20, %s1613_s20   ;;  %s1108_s19 = sphi %s1195_s19, %s1621_s19   ;;  %s1104_s18 = sphi %s1193_s18, %s1620_s18  }
  0x11   : > { %1580 = sst [smem:[#allocation12_spill]] %s1132_s25  ;;  %p48_p0 = scmp.eq.s32.totalorder %s1152_s30, 0 }
  0x12   : > { %1581 = sst [smem:[#allocation13_spill]] %s1136_s26  ;;  %p1262_p1 = scmp.ge.s32.totalorder %s1564_s6, 3 }
  0x13   : > { %1582 = sst [smem:[#allocation14_spill]] %s1140_s27  ;;  %p115_p2 = scmp.ne.s32.totalorder %s1120_s22, %s1116_s21 }
  0x14   : > { %1583 = sst [smem:[#allocation15_spill]] %s1148_s29  ;;  %p121_p3 = scmp.ne.s32.totalorder %s1116_s21, %s1112_s20 }
  0x15   : > { %p843_p4 = scmp.lt.s32.totalorder %s1152_s30, 6  ;;  %p117_p5 = por %p115_p2, %p48_p0 }
  0x16   : > { %s226_s9 = sand.u32 1, %s1152_s30   ;;  %s1565_s10 = sand.u32 1, %s1120_s22  }
  0x17   : > { %s802_s11 = sshll.u32 %s1565_s10, 9  ;;  %s824_s12 = sshll.u32 %s1144_s28, 9 }
  0x18   : > { %s1585_s3 = sld [smem:[#allocation24_spill]]  ;;  %s230_s16 = scalar_lea.vmem [#allocation5], %s802_s11 }
  0x19   : > { %s237_s17 = sshll.u32 %s230_s16, 4  ;;  %p1284_p6 = pnand %p843_p4, %p117_p5  ;;  %s238_s17 = int_to_ptr.vmem [resolvable:$true] %s237_s17 }
  0x1a   : > { %p808_p7 = scmp.ge.s32.totalorder %s1152_s30, 1  ;;  %s1289_s8 = scalar_lea.sflag [#allocation6], %s226_s9 }
  0x1b   : > { %p1568_p8 = pneg %p1284_p6  ;;  %s971_s10 = scalar_lea.vmem %s238_s17, 8192 }
  0x1c   : > { %p972_p9 = scmp.ne.s32.totalorder %s238_s17, %s971_s10  ;;  %s1154_s11 = smov [#allocation5]  }
  0x1e   : > { %s236_s15 = scalar_lea.hbm %s1585_s3, %s824_s12  ;;  %p974_p10 = pnand %p972_p9, %p1568_p8 }
  0x1f   : > { %s976_s12 = sshll.u32 %s1154_s11, 4  ;;  %s977_s12 = int_to_ptr.vmem [resolvable:$false] %s976_s12 }
  0x20   : > { %p975_p11 = pneg %p974_p10  ;;  %s978_s13 = scalar_lea.vmem %s977_s12, 16384 }
  0x21   : > { %p979_p12 = scmp.lt.s32.totalorder %s238_s17, %s977_s12  ;;  %p980_p13 = scmp.lt.s32.totalorder %s978_s13, %s971_s10 }
  0x23   : > { %p981_p2 = por %p980_p13, %p979_p12 }
  0x25   : > { %p982_p5 = pnand %p981_p2, %p975_p11 }
  0x27   : > { %985 = shalt.err (!%p982_p5)
}
  0x28   : > { %s1155_s14 = smov 1536   ;;  %s1156_s9 = smov 512  }
  0x29   : > { %s1157_s10 = smov 32   ;;  %p264_p9 = scmp.lt.s32.totalorder %s1152_s30, 7 }
  0x2a   : > { %839 = dma.hbm_to_vmem [thread:$0]  (!%p1284_p6), %s236_s15, 8192, %s238_s17, %s1289_s8, %s1155_s14, %s1156_s9, %s1157_s10  }
  0x2b   : > { %p1302_p10 = pnand %p808_p7, %p264_p9  ;;  %s1307_s11 = sadd.s32 4294967295, %s1152_s30  }
  0x2c   : > { %s33_s12 = sadd.s32 1, %s1148_s29  ;;  %s1588_s13 = sadd.s32 1, %s1144_s28 }
  0x2d   : > { %s1629_s13 = smov (%p1262_p1, %s1588_s13), 0  ;;  %s1631_s12 = smov (!%p1262_p1, %s33_s12), %s1148_s29 }
  0x2e   : > { %1589 = sst [smem:[#allocation16_spill]] %s1629_s13  ;;  %s40_s15 = sadd.s32 1, %s1132_s25 }
  0x2f   : > { %p47_p7 = scmp.ne.s32.totalorder %s1132_s25, %s1128_s24  ;;  %p35_p11 = scmp.ge.s32.totalorder %s1631_s12, 2 }
  0x30   : > { %p53_p12 = scmp.ne.s32.totalorder %s1128_s24, %s1124_s23  ;;  %p54_p2 = scmp.eq.s32.totalorder %s1307_s11, 0 }
  0x31   : > { %p1326_p13 = por %p48_p0, %p47_p7  ;;  %s1633_s12 = smov (%p35_p11, %s1631_s12), 0 }
  0x32   : > { %1591 = sst [smem:[#allocation17_spill]] %s1633_s12  ;;  %p1333_p1 = por %p54_p2, %p53_p12 }
  0x33   : > { %s105_s14 = ssub.s32 %s1144_s28, %s1629_s13  ;;  %s37_s9 = ssub.s32 %s1148_s29, %s1633_s12 }
  0x34   : > { %p106_p5 = scmp.eq.s32.totalorder %s105_s14, 0  ;;  %p38_p9 = scmp.eq.s32.totalorder %s37_s9, 0 }
  0x35   : > { %p1344_p0 = por %p121_p3, %p54_p2  ;;  %s1595_s10 = sadd.s32 1, %s1120_s22 }
  0x36   : > { %s1351_s3 = scalar_select %p106_p5, %s1120_s22, %s1595_s10  }
  0x37   : > { %s1593_s23 = scalar_select %p1344_p0, 1, 0 }
  0x38   : > { %1596 = sst [smem:[#allocation19_spill]] %s1351_s3  ;;  %s159_s27 = sor.u32 %s105_s14, %s37_s9 }
  0x39   : > { %1594 = sst [smem:[#allocation18_spill]] %s1593_s23  ;;  %s162_s2 = sadd.s32 1, %s1108_s19 }
  0x3a   : > { %s1354_s5 = scalar_select %p38_p9, %s1132_s25, %s40_s15  }
  0x3b   : > { %p160_p7 = scmp.eq.s32.totalorder %s159_s27, 0  ;;  %p172_p11 = scmp.ne.s32.totalorder %s1108_s19, %s1104_s18 }
  0x3c   : > { %1597 = sst [smem:[#allocation20_spill]] %s1354_s5  ;;  %p173_p12 = scmp.eq.s32.totalorder %s1307_s11, 5 }
  0x3d   : > { %s205_s12 = sand.u32 1, %s1132_s25   ;;  %s823_s26 = sshll.u32 %s1148_s29, 8 }
  0x3e   : > { %s1362_s13 = scalar_select %p160_p7, %s1108_s19, %s162_s2  }
  0x3f   : > { %p1364_p8 = por %p173_p12, %p172_p11  ;;  %s799_s1 = sshll.u32 %s205_s12, 4 }
  0x40   : > { %s1599_s0 = sld [smem:[#allocation21_spill]]  ;;  %s209_s15 = scalar_lea.vmem [#allocation3], %s799_s1 }
  0x41   : > { %s1598_s20 = scalar_select %p1364_p8, 1, 0 }
  0x42   : > { %s216_s5 = sshll.u32 %s209_s15, 4  ;;  %p1376_p3 = pnand %p843_p4, %p1326_p13  ;;  %s217_s5 = int_to_ptr.vmem [resolvable:$true] %s216_s5 }
  0x43   : > { %s206_s2 = scalar_lea.sflag [#allocation4], %s205_s12  ;;  %s999_s14 = scalar_lea.vmem %s217_s5, 256 }
  0x44   : > { %p988_p2 = pneg %p1376_p3  ;;  %p1000_p5 = scmp.ne.s32.totalorder %s217_s5, %s999_s14 }
  0x45   : > { %s1158_s9 = smov [#allocation3]  }
  0x46   : > { %s215_s10 = scalar_lea.hbm %s1599_s0, %s823_s26  ;;  %p1002_p9 = pnand %p1000_p5, %p988_p2 }
  0x47   : > { %s1004_s21 = sshll.u32 %s1158_s9, 4  ;;  %s1005_s21 = int_to_ptr.vmem [resolvable:$false] %s1004_s21 }
  0x48   : > { %p1003_p7 = pneg %p1002_p9  ;;  %s1006_s1 = scalar_lea.vmem %s1005_s21, 512 }
  0x49   : > { %p1007_p11 = scmp.lt.s32.totalorder %s217_s5, %s1005_s21  ;;  %p1008_p12 = scmp.lt.s32.totalorder %s1006_s1, %s999_s14 }
  0x4b   : > { %p1009_p8 = por %p1008_p12, %p1007_p11 }
  0x4d   : > { %p1010_p4 = pnand %p1009_p8, %p1003_p7 }
  0x4f   : > { %1013 = shalt.err (!%p1010_p4)
}
  0x50   : > { %s1159_s26 = smov 128   ;;  %s1160_s12 = smov 8  }
  0x51   : > { %836 = dma.hbm_to_vmem [thread:$0]  (!%p1376_p3), %s215_s10, 256, %s217_s5, %s206_s2, %s1159_s26, %s1159_s26, %s1160_s12  }
  0x52   : > { %s1601_s17 = sand.u32 1, %s1120_s22   ;;  %s825_s15 = sshll.u32 %s1144_s28, 6 }
  0x53   : > { %s805_s23 = sshll.u32 %s1601_s17, 2  ;;  %s257_s29 = scalar_lea.hbm %s1562_s4, %s825_s15 }
  0x54   : > { %s251_s21 = scalar_lea.vmem [#allocation7], %s805_s23  ;;  %p1602_p13 = pneg %p1284_p6 }
  0x55   : > { %s259_s14 = sshll.u32 %s251_s21, 4  ;;  %s1161_s25 = smov [#allocation7]   ;;  %s260_s14 = int_to_ptr.vmem [resolvable:$true] %s259_s14 }
  0x56   : > { %s1027_s1 = scalar_lea.vmem %s260_s14, 64  ;;  %s1032_s3 = sshll.u32 %s1161_s25, 4  ;;  %s1033_s3 = int_to_ptr.vmem [resolvable:$false] %s1032_s3 }
  0x57   : > { %p1028_p8 = scmp.ne.s32.totalorder %s260_s14, %s1027_s1  ;;  %s1034_s5 = scalar_lea.vmem %s1033_s3, 128 }
  0x58   : > { %p1035_p3 = scmp.lt.s32.totalorder %s260_s14, %s1033_s3  ;;  %p1036_p9 = scmp.lt.s32.totalorder %s1034_s5, %s1027_s1 }
  0x59   : > { %p1030_p2 = pnand %p1028_p8, %p1602_p13 }
  0x5a   : > { %p1037_p7 = por %p1036_p9, %p1035_p3 }
  0x5b   : > { %p1031_p5 = pneg %p1030_p2 }
  0x5d   : > { %p1038_p11 = pnand %p1037_p7, %p1031_p5 }
  0x5f   : > { %1041 = shalt.err (!%p1038_p11)
}
  0x60   : > { %842 = dma.hbm_to_vmem [thread:$0]  (!%p1284_p6), %s257_s29, 64, %s260_s14, %s1289_s8  }
  0x61   : > { %268 = sbr.rel (%p1302_p10) target bundleno = 684 (0x2ac), region = 40  ;;  %s270_s0 = sand.u32 (!%p1302_p10), 1, %s1128_s24  }
  0x62   : > { %s809_s10 = sshll.u32 (!%p1302_p10), %s270_s0, 4  ;;  %s271_s27 = scalar_lea.sflag (!%p1302_p10), [#allocation4], %s270_s0 }
  0x63   : > { %s274_s25 = scalar_lea.vmem (!%p1302_p10), [#allocation3], %s809_s10 }
  0x66   : > { %1095 = dma.done.wait (%p1333_p1), %s271_s27, 256  }
  0x67   : > { %1097 = vsyncadd (%p1333_p1), %s271_s27, 4294967040  ;;  %s1603_s3 = sld [smem:[#allocation11_spill]]  ;;  %s279_s6 = sand.u32 1, %s1307_s11  }
  0x68   : > { %s280_s8 = scalar_lea.sflag [#allocation6], %s279_s6 }
  0x6d   : > { %s281_s26 = sand.u32 1, %s1603_s3  }
  0x6e   : > { %s810_s29 = sshll.u32 %s281_s26, 9 }
  0x6f   : > { %s1405_s16 = scalar_lea.vmem [#allocation5], %s810_s29 }
  0x70   : > { %1099 = dma.done.wait (%p1344_p0), %s280_s8, 8256  }
  0x71   : > { %1101 = vsyncadd (%p1344_p0), %s280_s8, 4294959040  ;;  %s1411_s12 = sshll.u32 %s281_s26, 2  ;;  %s325_s7 = sand.u32 1, %s1104_s18  }
  0x72   : > { %s812_s17 = sshll.u32 %s325_s7, 6  ;;  %s292_s23 = scalar_lea.vmem [#allocation7], %s1411_s12 }
  0x73   : > { %s1415_s15 = scalar_lea.vmem [#allocation8], %s812_s17  ;;  %s1605_s11 = sld [smem:[#allocation13_spill]] }
  0x79   : > { %p813_p6 = scmp.ne.s32.totalorder %s1605_s11, 0 }
  0x7a   : > { %s1606_s21 = sld [smem:[#allocation22_spill]] (!%p813_p6) }
  0x7b   : > { %336 = sbr.rel (%p813_p6) target bundleno = 440 (0x1b8), region = 56  ;;  %s1607_s5 = sld [smem:[#allocation23_spill]] (!%p813_p6) }
  0x80   : > { %v337_v0 = vld [vmem:[%s274_s25] sm:$0xff]  ;;  %v338_v1 = vld [vmem:[%s274_s25 + $0x8] sm:$0xff] }
  0x81   : > { %339 = vadd.xlane.f32.xlu0 %v337_v0  ;;  %v814_v17 = vld [vmem:[%s1606_s21] ss:$0 sm:$0xff] }
  0x82   : > { %v815_v19 = vld [vmem:[%s1607_s5] ss:$0 sm:$0xff] }
  0x85   : > { %341 = vadd.xlane.f32.xlu0 %v338_v1 }
 0x10a   : > { %v340_v2 = vpop.xlane.xlu0 %339 }
 0x10b   : > { %v344_v3 = vmul.f32 0.0078125, %v340_v2 }
 0x10d   : > { %v346_v4 = vsub.f32 %v337_v0, %v344_v3 }
 0x10e   : > { %v342_v5 = vpop.xlane.xlu0 %341 }
 0x10f   : > { %v345_v6 = vmul.f32 0.0078125, %v342_v5  ;;  %v348_v7 = vmul.f32 %v346_v4, %v346_v4 }
 0x111   : > { %v347_v8 = vsub.f32 %v338_v1, %v345_v6  ;;  %350 = vadd.xlane.f32.xlu1 %v348_v7 }
 0x113   : > { %v349_v9 = vmul.f32 %v347_v8, %v347_v8 }
 0x115   : > { %352 = vadd.xlane.f32.xlu1 %v349_v9 }
 0x19a   : > { %v351_v10 = vpop.xlane.xlu1 %350 }
 0x19b   : > { %v354_v11 = vmul.f32 0.0078125, %v351_v10 }
 0x19d   : > { %v356_v12 = vadd.f32 1e-06, %v354_v11 }
 0x19e   : > { %v353_v13 = vpop.xlane.xlu1 %352 }
 0x19f   : > { %954 = vrsqrt.f32 %v356_v12  ;;  %v355_v14 = vmul.f32 0.0078125, %v353_v13 }
 0x1a1   : > { %v357_v15 = vadd.f32 1e-06, %v355_v14 }
 0x1a3   : > { %956 = vrsqrt.f32 %v357_v15 }
 0x1ac   : > { %v955_v16 = vpop.eup %954 }
 0x1ad   : > { %v360_v18 = vmul.f32 %v955_v16, %v346_v4 }
 0x1af   : > { %v369_v20 = vmul.f32 %v814_v17, %v360_v18 }
 0x1b0   : > { %v957_v21 = vpop.eup %956 }
 0x1b1   : > { %v378_v22 = vadd.f32 %v815_v19, %v369_v20  ;;  %v361_v23 = vmul.f32 %v957_v21, %v347_v8 }
 0x1b3   : > { %380 = vst [vmem:[#allocation2] sm:$0xff] %v378_v22  ;;  %v370_v24 = vmul.f32 %v814_v17, %v361_v23 }
 0x1b5   : > { %v379_v25 = vadd.f32 %v815_v19, %v370_v24 }
 0x1b7   : > { %381 = vst [vmem:[#allocation2 + $0x8] sm:$0xff] %v379_v25 }
 0x1b8 PF: > { %v445_v26 = vld [vmem:[%s1405_s16 + $0x1e8] sm:$0xff]  ;;  %v447_v27 = vld [vmem:[%s1405_s16 + $0x1f8] sm:$0xff]  ;;  %v444_v28 = vld [vmem:[%s1405_s16 + $0x1e0] sm:$0xff]  ;;  %p1608_p10 = scmp.ne.s32.totalorder %s1598_s20, 0 }
 0x1b9   : > { %470 = vmatprep.subr.mxu0 %v445_v26  ;;  %547 = vmatprep.subr.mxu1 %v447_v27  ;;  %v446_v29 = vld [vmem:[%s1405_s16 + $0x1f0] sm:$0xff]  ;;  %v441_v30 = vld [vmem:[%s1405_s16 + $0x1c8] sm:$0xff]  ;;  %v443_v31 = vld [vmem:[%s1405_s16 + $0x1d8] sm:$0xff]  ;;  %v1162_v27 = vmov 0.0   ;;  %s1609_s0 = sld [smem:[#allocation13_spill]] (%p1608_p10) }
 0x1ba   : > { %471 = vmatpush1.msra.mxu0 %v444_v28  ;;  %548 = vmatpush1.msra.mxu1 %v446_v29  ;;  %v440_v32 = vld [vmem:[%s1405_s16 + $0x1c0] sm:$0xff]  ;;  %v442_v33 = vld [vmem:[%s1405_s16 + $0x1d0] sm:$0xff]  ;;  %v437_v34 = vld [vmem:[%s1405_s16 + $0x1a8] sm:$0xff]  ;;  %v450_v29 = vlaneseq  ;;  %s1610_s10 = sld [smem:[#allocation14_spill]] (%p1608_p10) }
 0x1bb   : > { %472 = vmatprep.subr.mxu0 %v441_v30  ;;  %549 = vmatprep.subr.mxu1 %v443_v31  ;;  %v439_v35 = vld [vmem:[%s1405_s16 + $0x1b8] sm:$0xff]  ;;  %v436_v36 = vld [vmem:[%s1405_s16 + $0x1a0] sm:$0xff]  ;;  %v438_v37 = vld [vmem:[%s1405_s16 + $0x1b0] sm:$0xff]  ;;  %s1611_s26 = sld [smem:[#allocation25_spill]] (%p1608_p10) }
 0x1bc   : > { %473 = vmatpush1.msra.mxu0 %v440_v32  ;;  %550 = vmatpush1.msra.mxu1 %v442_v33  ;;  %v433_v38 = vld [vmem:[%s1405_s16 + $0x188] sm:$0xff]  ;;  %v435_v39 = vld [vmem:[%s1405_s16 + $0x198] sm:$0xff]  ;;  %v432_v40 = vld [vmem:[%s1405_s16 + $0x180] sm:$0xff]  ;;  %v451_v30 = vshrl.u32 %v450_v29, 7 }
 0x1bd   : > { %474 = vmatprep.subr.mxu0 %v437_v34  ;;  %551 = vmatprep.subr.mxu1 %v439_v35  ;;  %v434_v41 = vld [vmem:[%s1405_s16 + $0x190] sm:$0xff]  ;;  %v429_v42 = vld [vmem:[%s1405_s16 + $0x168] sm:$0xff]  ;;  %v431_v43 = vld [vmem:[%s1405_s16 + $0x178] sm:$0xff] }
 0x1be   : > { %475 = vmatpush1.msra.mxu0 %v436_v36  ;;  %552 = vmatpush1.msra.mxu1 %v438_v37  ;;  %v428_v44 = vld [vmem:[%s1405_s16 + $0x160] sm:$0xff]  ;;  %v430_v45 = vld [vmem:[%s1405_s16 + $0x170] sm:$0xff]  ;;  %v425_v46 = vld [vmem:[%s1405_s16 + $0x148] sm:$0xff]  ;;  %v452_v31 = vsub.s32 0, %v451_v30  ;;  %v460_v32 = vsub.s32 2, %v451_v30  ;;  %v456_v34 = vsub.s32 1, %v451_v30 }
 0x1bf   : > { %476 = vmatprep.subr.mxu0 %v433_v38  ;;  %553 = vmatprep.subr.mxu1 %v435_v39  ;;  %v427_v47 = vld [vmem:[%s1405_s16 + $0x158] sm:$0xff]  ;;  %v424_v48 = vld [vmem:[%s1405_s16 + $0x140] sm:$0xff]  ;;  %v426_v49 = vld [vmem:[%s1405_s16 + $0x150] sm:$0xff]  ;;  %v464_v35 = vsub.s32 3, %v451_v30  ;;  %s818_s27 = sshll.u32 (%p1608_p10), %s1609_s0, 2 }
 0x1c0   : > { %477 = vmatpush1.msra.mxu0 %v432_v40  ;;  %554 = vmatpush1.msra.mxu1 %v434_v41  ;;  %v421_v50 = vld [vmem:[%s1405_s16 + $0x128] sm:$0xff]  ;;  %v423_v51 = vld [vmem:[%s1405_s16 + $0x138] sm:$0xff]  ;;  %v420_v52 = vld [vmem:[%s1405_s16 + $0x120] sm:$0xff]  ;;  %s826_s25 = smul.u32 (%p1608_p10), 24, %s1610_s10 }
 0x1c1   : > { %478 = vmatprep.subr.mxu0 %v429_v42  ;;  %555 = vmatprep.subr.mxu1 %v431_v43  ;;  %v422_v53 = vld [vmem:[%s1405_s16 + $0x130] sm:$0xff]  ;;  %v417_v54 = vld [vmem:[%s1405_s16 + $0x108] sm:$0xff]  ;;  %v419_v55 = vld [vmem:[%s1405_s16 + $0x118] sm:$0xff] }
 0x1c2   : > { %479 = vmatpush1.msra.mxu0 %v428_v44  ;;  %556 = vmatpush1.msra.mxu1 %v430_v45  ;;  %v416_v56 = vld [vmem:[%s1405_s16 + $0x100] sm:$0xff]  ;;  %v418_v57 = vld [vmem:[%s1405_s16 + $0x110] sm:$0xff]  ;;  %v413_v58 = vld [vmem:[%s1405_s16 + $0xe8] sm:$0xff]  ;;  %s642_s3 = sadd.s32 (%p1608_p10), %s826_s25, %s818_s27 }
 0x1c3   : > { %480 = vmatprep.subr.mxu0 %v425_v46  ;;  %557 = vmatprep.subr.mxu1 %v427_v47  ;;  %v415_v59 = vld [vmem:[%s1405_s16 + $0xf8] sm:$0xff]  ;;  %v412_v60 = vld [vmem:[%s1405_s16 + $0xe0] sm:$0xff]  ;;  %v414_v61 = vld [vmem:[%s1405_s16 + $0xf0] sm:$0xff]  ;;  %s820_s20 = sshll.u32 (%p1608_p10), %s642_s3, 3 }
 0x1c4   : > { %481 = vmatpush1.msra.mxu0 %v424_v48  ;;  %558 = vmatpush1.msra.mxu1 %v426_v49  ;;  %v409_v62 = vld [vmem:[%s1405_s16 + $0xc8] sm:$0xff]  ;;  %v411_v63 = vld [vmem:[%s1405_s16 + $0xd8] sm:$0xff]  ;;  %v408_v0 = vld [vmem:[%s1405_s16 + $0xc0] sm:$0xff]  ;;  %s644_s29 = scalar_lea.vmem (%p1608_p10), %s1611_s26, %s820_s20 }
 0x1c5   : > { %482 = vmatprep.subr.mxu0 %v421_v50  ;;  %559 = vmatprep.subr.mxu1 %v423_v51  ;;  %v410_v1 = vld [vmem:[%s1405_s16 + $0xd0] sm:$0xff]  ;;  %v405_v2 = vld [vmem:[%s1405_s16 + $0xa8] sm:$0xff]  ;;  %v407_v3 = vld [vmem:[%s1405_s16 + $0xb8] sm:$0xff] }
 0x1c6   : > { %483 = vmatpush1.msra.mxu0 %v420_v52  ;;  %560 = vmatpush1.msra.mxu1 %v422_v53  ;;  %v404_v4 = vld [vmem:[%s1405_s16 + $0xa0] sm:$0xff]  ;;  %v406_v5 = vld [vmem:[%s1405_s16 + $0xb0] sm:$0xff]  ;;  %v401_v6 = vld [vmem:[%s1405_s16 + $0x88] sm:$0xff] }
 0x1c7   : > { %484 = vmatprep.subr.mxu0 %v417_v54  ;;  %561 = vmatprep.subr.mxu1 %v419_v55  ;;  %v403_v7 = vld [vmem:[%s1405_s16 + $0x98] sm:$0xff]  ;;  %v400_v8 = vld [vmem:[%s1405_s16 + $0x80] sm:$0xff]  ;;  %v402_v9 = vld [vmem:[%s1405_s16 + $0x90] sm:$0xff] }
 0x1c8   : > { %485 = vmatpush1.msra.mxu0 %v416_v56  ;;  %562 = vmatpush1.msra.mxu1 %v418_v57  ;;  %v397_v10 = vld [vmem:[%s1405_s16 + $0x68] sm:$0xff]  ;;  %v399_v11 = vld [vmem:[%s1405_s16 + $0x78] sm:$0xff]  ;;  %v396_v12 = vld [vmem:[%s1405_s16 + $0x60] sm:$0xff] }
 0x1c9   : > { %486 = vmatprep.subr.mxu0 %v413_v58  ;;  %563 = vmatprep.subr.mxu1 %v415_v59  ;;  %v398_v13 = vld [vmem:[%s1405_s16 + $0x70] sm:$0xff]  ;;  %v393_v14 = vld [vmem:[%s1405_s16 + $0x48] sm:$0xff]  ;;  %v395_v15 = vld [vmem:[%s1405_s16 + $0x58] sm:$0xff] }
 0x1ca   : > { %487 = vmatpush1.msra.mxu0 %v412_v60  ;;  %564 = vmatpush1.msra.mxu1 %v414_v61  ;;  %v392_v16 = vld [vmem:[%s1405_s16 + $0x40] sm:$0xff]  ;;  %v394_v17 = vld [vmem:[%s1405_s16 + $0x50] sm:$0xff]  ;;  %v389_v18 = vld [vmem:[%s1405_s16 + $0x28] sm:$0xff] }
 0x1cb   : > { %488 = vmatprep.subr.mxu0 %v409_v62  ;;  %565 = vmatprep.subr.mxu1 %v411_v63  ;;  %v391_v19 = vld [vmem:[%s1405_s16 + $0x38] sm:$0xff]  ;;  %v388_v20 = vld [vmem:[%s1405_s16 + $0x20] sm:$0xff]  ;;  %v390_v21 = vld [vmem:[%s1405_s16 + $0x30] sm:$0xff] }
 0x1cc   : > { %489 = vmatpush1.msra.mxu0 %v408_v0  ;;  %566 = vmatpush1.msra.mxu1 %v410_v1  ;;  %v385_v22 = vld [vmem:[%s1405_s16 + $0x8] sm:$0xff]  ;;  %v387_v23 = vld [vmem:[%s1405_s16 + $0x18] sm:$0xff]  ;;  %v384_v24 = vld [vmem:[%s1405_s16] sm:$0xff] }
 0x1cd   : > { %490 = vmatprep.subr.mxu0 %v405_v2  ;;  %567 = vmatprep.subr.mxu1 %v407_v3  ;;  %v386_v25 = vld [vmem:[%s1405_s16 + $0x10] sm:$0xff]  ;;  %v383_v28 = vld [vmem:[#allocation2 + $0x8] sm:$0xff]  ;;  %v448_v33 = vld [vmem:[%s292_s23] sm:$0xf] }
 0x1ce   : > { %491 = vmatpush1.msra.mxu0 %v404_v4  ;;  %568 = vmatpush1.msra.mxu1 %v406_v5  ;;  %v382_v26 = vld [vmem:[#allocation2] sm:$0xff]  ;;  %v453_v36 = vrot.slane %v448_v33, %v452_v31  ;;  %v461_v37 = vrot.slane %v448_v33, %v460_v32  ;;  %v457_v38 = vrot.slane %v448_v33, %v456_v34 }
 0x1cf   : > { %492 = vmatprep.subr.mxu0 %v401_v6  ;;  %569 = vmatprep.subr.mxu1 %v403_v7  ;;  %v465_v39 = vrot.slane %v448_v33, %v464_v35 }
 0x1d0   : > { %493 = vmatpush1.msra.mxu0 %v400_v8  ;;  %570 = vmatpush1.msra.mxu1 %v402_v9 }
 0x1d1   : > { %494 = vmatprep.subr.mxu0 %v397_v10  ;;  %571 = vmatprep.subr.mxu1 %v399_v11 }
 0x1d2   : > { %495 = vmatpush1.msra.mxu0 %v396_v12  ;;  %572 = vmatpush1.msra.mxu1 %v398_v13 }
 0x1d3   : > { %496 = vmatprep.subr.mxu0 %v393_v14  ;;  %573 = vmatprep.subr.mxu1 %v395_v15 }
 0x1d4   : > { %497 = vmatpush1.msra.mxu0 %v392_v16  ;;  %574 = vmatpush1.msra.mxu1 %v394_v17 }
 0x1d5   : > { %498 = vmatprep.subr.mxu0 %v389_v18  ;;  %575 = vmatprep.subr.mxu1 %v391_v19 }
 0x1d6   : > { %499 = vmatpush1.msra.mxu0 %v388_v20  ;;  %576 = vmatpush1.msra.mxu1 %v390_v21 }
 0x1d7   : > { %500 = vmatprep.subr.mxu0 %v385_v22  ;;  %577 = vmatprep.subr.mxu1 %v387_v23 }
 0x1d8   : > { %501 = vmatpush1.msra.mxu0 %v384_v24  ;;  %534 = vmatprep.mubr.f32.mxu0 %v1162_v27 }
 0x1d9   : > { %578 = vmatpush1.msra.mxu1 %v386_v25  ;;  %611 = vmatprep.mubr.f32.mxu1 %v1162_v27 }
 0x1da   : > { %535 = vmatmul.mubr.f32.vlgmr.msra.gmra.mxu0 %v382_v26  ;;  %612 = vmatmul.mubr.f32.vlgmr.msra.gmra.mxu1 %v382_v26 }
 0x1db   : > { %540 = vmatprep.mubr.f32.mxu0 %v1162_v27  ;;  %617 = vmatprep.mubr.f32.mxu1 %v1162_v27 }
 0x1de   : > { %541 = vmatmul.mubr.f32.gmra.mxu0 %v383_v28  ;;  %618 = vmatmul.mubr.f32.gmra.mxu1 %v383_v28 }
 0x29a   : > { %v536_v40 = vpop.f32.mrf.mxu0  ;;  %v613_v41 = vpop.f32.mrf.mxu1 }
 0x29b   : > { %v537_v42 = vadd.f32 %v536_v40, %v453_v36  ;;  %v614_v43 = vadd.f32 %v613_v41, %v461_v37 }
 0x29c   : > { %v538_v44 = vpop.f32.mrf.mxu0  ;;  %v615_v45 = vpop.f32.mrf.mxu1 }
 0x29d   : > { %624 = vst [vmem:[%s1415_s15] sm:$0xff] %v537_v42  ;;  %626 = vst [vmem:[%s1415_s15 + $0x10] sm:$0xff] %v614_v43  ;;  %v539_v46 = vadd.f32 %v538_v44, %v457_v38  ;;  %v616_v47 = vadd.f32 %v615_v45, %v465_v39 }
 0x29e   : > { %v542_v48 = vpop.f32.mrf.mxu0  ;;  %v619_v49 = vpop.f32.mrf.mxu1 }
 0x29f   : > { %625 = vst [vmem:[%s1415_s15 + $0x8] sm:$0xff] %v539_v46  ;;  %627 = vst [vmem:[%s1415_s15 + $0x18] sm:$0xff] %v616_v47  ;;  %v543_v50 = vadd.f32 %v542_v48, %v453_v36  ;;  %v620_v51 = vadd.f32 %v619_v49, %v461_v37  ;;  %638 = sbr.rel (!%p1608_p10) target bundleno = 684 (0x2ac), region = 60 }
 0x2a0   : > { %v544_v52 = vpop.f32.mrf.mxu0  ;;  %v621_v53 = vpop.f32.mrf.mxu1 }
 0x2a1   : > { %628 = vst [vmem:[%s1415_s15 + $0x20] sm:$0xff] %v543_v50  ;;  %630 = vst [vmem:[%s1415_s15 + $0x30] sm:$0xff] %v620_v51  ;;  %v545_v54 = vadd.f32 %v544_v52, %v457_v38  ;;  %v622_v55 = vadd.f32 %v621_v53, %v465_v39 }
 0x2a3   : > { %629 = vst [vmem:[%s1415_s15 + $0x28] sm:$0xff] %v545_v54  ;;  %631 = vst [vmem:[%s1415_s15 + $0x38] sm:$0xff] %v622_v55 }
 0x2a4   : > { %v657_v56 = vld [vmem:[%s1415_s15] sm:$0xff]  ;;  %v661_v58 = vld [vmem:[%s1415_s15 + $0x10] sm:$0xff] }
 0x2a5   : > { %658 = vst [vmem:[%s644_s29] sm:$0xff] %v657_v56  ;;  %662 = vst [vmem:[%s644_s29 + $0x10] sm:$0xff] %v661_v58 }
 0x2a6   : > { %v659_v57 = vld [vmem:[%s1415_s15 + $0x8] sm:$0xff]  ;;  %v663_v59 = vld [vmem:[%s1415_s15 + $0x18] sm:$0xff] }
 0x2a7   : > { %660 = vst [vmem:[%s644_s29 + $0x8] sm:$0xff] %v659_v57  ;;  %664 = vst [vmem:[%s644_s29 + $0x18] sm:$0xff] %v663_v59 }
 0x2a8   : > { %v665_v60 = vld [vmem:[%s1415_s15 + $0x20] sm:$0xff]  ;;  %v669_v62 = vld [vmem:[%s1415_s15 + $0x30] sm:$0xff] }
 0x2a9   : > { %666 = vst [vmem:[%s644_s29 + $0x60] sm:$0xff] %v665_v60  ;;  %670 = vst [vmem:[%s644_s29 + $0x70] sm:$0xff] %v669_v62 }
 0x2aa   : > { %v667_v61 = vld [vmem:[%s1415_s15 + $0x28] sm:$0xff]  ;;  %v671_v63 = vld [vmem:[%s1415_s15 + $0x38] sm:$0xff] }
 0x2ab   : > { %668 = vst [vmem:[%s644_s29 + $0x68] sm:$0xff] %v667_v61  ;;  %672 = vst [vmem:[%s644_s29 + $0x78] sm:$0xff] %v671_v63 }
 0x2ac PF: > { %s21_s30 = sadd.s32 1, %s1152_s30   ;;  %s1613_s20 = sld [smem:[#allocation11_spill]] }
 0x2ad   : > { %p1514_p1 = scmp.ge.s32.totalorder %s21_s30, 8   ;;  %s1614_s16 = sld [smem:[#allocation19_spill]] }
 0x2ae   : > { %s1615_s12 = sld [smem:[#allocation12_spill]]  ;;  %s1620_s18 = smov %s1108_s19 }
 0x2af   : > { %s1616_s25 = sld [smem:[#allocation20_spill]]  ;;  %s1621_s19 = smov %s1362_s13 }
 0x2b0   : > { %s1617_s27 = sld [smem:[#allocation15_spill]]  ;;  %s1622_s21 = smov %s1120_s22 }
 0x2b1   : > { %s1618_s7 = sld [smem:[#allocation16_spill]]  ;;  %s1624_s23 = smov %s1128_s24 }
 0x2b2   : > { %s1619_s29 = sld [smem:[#allocation17_spill]]  ;;  %s1626_s26 = smov %s1144_s28 }
 0x2b3   : > { %s1623_s22 = smov %s1614_s16  ;;  %20 = sbr.rel (!%p1514_p1) target bundleno = 16 (0x10), region = 131 }
 0x2b4   : > { %s1625_s24 = smov %s1615_s12 }
 0x2b7   : > { %s1627_s28 = smov %s1618_s7 }
 0x2b8   :  { %688 = vsyncpa [#allocation4], 1 }
 0x2b9   :  { %690 = vsyncpa [#allocation4 + $0x1], 1 }
 0x2ba   :  { %691 = vsyncpa [#allocation6], 1 }
 0x2bb   :  { %693 = vsyncpa [#allocation6 + $0x1], 1 }

// kernel: idefics2_encoder_layer.7
= control target key start
LH: loop header
LB: loop body
LE: loop exit
PB: predicated region body
PF: predicated region fallthrough
CT: control target
= control target key end

     0   :  { %12 = vsyncpa [#allocation5], 0  ;;  %s1946_s0 = inlined_call_operand.vmem [shape: f32[32,128], index: 0, kind: input, shape index: {}]   ;;  %s1947_s1 = inlined_call_operand.vmem [shape: f32[1,128], index: 1, kind: input, shape index: {}]   ;;  %s1948_s2 = inlined_call_operand.vmem [shape: f32[1,128], index: 2, kind: input, shape index: {}]   ;;  %s1949_s3 = inlined_call_operand.vmem [shape: f32[128,512], index: 3, kind: input, shape index: {}]   ;;  %s1950_s4 = inlined_call_operand.vmem [shape: f32[1,512], index: 4, kind: input, shape index: {}]   ;;  %s1951_s5 = inlined_call_operand.vmem [shape: f32[512,128], index: 5, kind: input, shape index: {}]   ;;  %s1952_s6 = inlined_call_operand.vmem [shape: f32[1,128], index: 6, kind: input, shape index: {}]   ;;  %s1953_s7 = inlined_call_operand.hbm [shape: f32[32,128], index: 7, kind: output, shape index: {}]  }
   0x1   :  { %14 = vsyncpa [#allocation5 + $0x1], 0  ;;  %s1382_s24 = smov 0   ;;  %s1384_s25 = smov 0  }
   0x2   :  { %s1386_s26 = smov 0   ;;  %s1388_s27 = smov 0  }
   0x3   :  { %s1390_s28 = smov 0   ;;  %s1392_s29 = smov 0  }
   0x4 LB: > { %s1086_s30 = sadd.s32 4294967295, %s1336_s29   ;;  %s1087_s8 = sadd.s32 4294967294, %s1336_s29   ;;  %s1336_s29 = sphi %s1392_s29, %s20_s29   ;;  %s1332_s28 = sphi %s1390_s28, %s1960_s28   ;;  %s1328_s27 = sphi %s1388_s27, %s1959_s27   ;;  %s1324_s26 = sphi %s1386_s26, %s1958_s26   ;;  %s1320_s25 = sphi %s1384_s25, %s1957_s25   ;;  %s1316_s24 = sphi %s1382_s24, %s1956_s24  }
   0x5   : > { %s32_s9 = sadd.s32 1, %s1332_s28  ;;  %s206_s10 = sadd.s32 1, %s1324_s26 }
   0x6   : > { %p34_p0 = scmp.ge.s32.totalorder %s32_s9, 2  ;;  %p216_p1 = scmp.ne.s32.totalorder %s1324_s26, %s1320_s25 }
   0x7   : > { %p217_p2 = scmp.eq.s32.totalorder %s1086_s30, 1  ;;  %p222_p3 = scmp.ne.s32.totalorder %s1320_s25, %s1316_s24 }
   0x8   : > { %s1962_s9 = smov (%p34_p0, %s32_s9), 0  ;;  %p223_p5 = scmp.eq.s32.totalorder %s1087_s8, 1 }
   0x9   : > { %p1422_p4 = por %p217_p2, %p216_p1  ;;  %s203_s12 = ssub.s32 %s1332_s28, %s1962_s9 }
   0xa   : > { %p1093_p6 = scmp.ge.s32.totalorder %s1336_s29, 1  ;;  %p204_p7 = scmp.eq.s32.totalorder %s203_s12, 0 }
   0xb   : > { %p1429_p8 = por %p223_p5, %p222_p3  ;;  %p285_p9 = scmp.lt.s32.totalorder %s1336_s29, 3 }
   0xc   : > { %s1435_s14 = scalar_select %p204_p7, %s1324_s26, %s206_s10  }
   0xd   : > { %p286_p10 = pnand %p1093_p6, %p285_p9 }
   0xe   : > { %s1095_s15 = sshll.u32 (!%p286_p10), %s1328_s27, 1  ;;  %s328_s22 = sand.u32 (!%p286_p10), 1, %s1320_s25  }
   0xf   : > { %289 = sbr.rel (%p286_p10) target bundleno = 779 (0x30b), region = 48  ;;  %p332_p11 = scmp.lt.s32.totalorder (!%p286_p10), %s1095_s15, 3 }
  0x10   : > { %s1094_s8 = sshll.u32 (!%p286_p10), %s328_s22, 4  ;;  %s1105_s10 = sshll.u32 (!%p286_p10), %s1328_s27, 8 }
  0x11   : > { %s330_s12 = scalar_lea.vmem (!%p286_p10), [#allocation4], %s1094_s8  ;;  %s1896_s18 = scalar_lea.hbm (!%p286_p10), %s1953_s7, %s1105_s10 }
  0x12   : > { %s1339_s20 = smov (!%p286_p10), [#allocation4]  }
  0x13   : > { %s1264_s21 = sshll.u32 (!%p286_p10), %s1339_s20, 4  ;;  %s1265_s21 = int_to_ptr.vmem [resolvable:$false] %s1264_s21 }
  0x14   : > { %s1964_s15 = smov (!%p332_p11, %s1095_s15), 3  ;;  %v469_v2 = vld [vmem:[%s1949_s3 + $0x1e8] sm:$0xff]  ;;  %v471_v3 = vld [vmem:[%s1949_s3 + $0x1f8] sm:$0xff]  ;;  %v468_v4 = vld [vmem:[%s1949_s3 + $0x1e0] sm:$0xff]  ;;  %s1266_s23 = scalar_lea.vmem %s1265_s21, 512 }
  0x15   : > { %s1096_s16 = sshll.u32 %s1964_s15, 3  ;;  %494 = vmatprep.subr.mxu0 %v469_v2  ;;  %571 = vmatprep.subr.mxu1 %v471_v3  ;;  %v470_v5 = vld [vmem:[%s1949_s3 + $0x1f0] sm:$0xff]  ;;  %v465_v6 = vld [vmem:[%s1949_s3 + $0x1c8] sm:$0xff]  ;;  %v467_v7 = vld [vmem:[%s1949_s3 + $0x1d8] sm:$0xff]  ;;  %s974_s15 = sshll.u32 %s330_s12, 4  ;;  %s1898_s15 = int_to_ptr.vmem [resolvable:$true] %s974_s15 }
  0x16   : > { %s335_s19 = scalar_lea.vmem %s1946_s0, %s1096_s16  ;;  %495 = vmatpush1.msra.mxu0 %v468_v4  ;;  %572 = vmatpush1.msra.mxu1 %v470_v5  ;;  %v464_v8 = vld [vmem:[%s1949_s3 + $0x1c0] sm:$0xff]  ;;  %v466_v9 = vld [vmem:[%s1949_s3 + $0x1d0] sm:$0xff]  ;;  %v461_v10 = vld [vmem:[%s1949_s3 + $0x1a8] sm:$0xff]  ;;  %s1260_s27 = scalar_lea.vmem %s1898_s15, 256 }
  0x17   : > { %v1441_v0 = vld [vmem:[%s335_s19] sm:$0xff]  ;;  %v1444_v1 = vld [vmem:[%s335_s19 + $0x8] sm:$0xff]  ;;  %496 = vmatprep.subr.mxu0 %v465_v6  ;;  %573 = vmatprep.subr.mxu1 %v467_v7  ;;  %v463_v11 = vld [vmem:[%s1949_s3 + $0x1b8] sm:$0xff]  ;;  %s1901_s19 = scalar_lea.sflag [#allocation5], %s328_s22  ;;  %p1261_p12 = scmp.ne.s32.totalorder %s1898_s15, %s1260_s27 }
  0x18   : > { %363 = vadd.xlane.f32.xlu0 %v1441_v0  ;;  %v460_v12 = vld [vmem:[%s1949_s3 + $0x1a0] sm:$0xff]  ;;  %v462_v13 = vld [vmem:[%s1949_s3 + $0x1b0] sm:$0xff]  ;;  %497 = vmatpush1.msra.mxu0 %v464_v8  ;;  %v457_v14 = vld [vmem:[%s1949_s3 + $0x188] sm:$0xff]  ;;  %p1267_p1 = scmp.lt.s32.totalorder %s1898_s15, %s1265_s21  ;;  %p1268_p2 = scmp.lt.s32.totalorder %s1266_s23, %s1260_s27 }
  0x19   : > { %574 = vmatpush1.msra.mxu1 %v466_v9  ;;  %v459_v15 = vld [vmem:[%s1949_s3 + $0x198] sm:$0xff]  ;;  %498 = vmatprep.subr.mxu0 %v461_v10  ;;  %v456_v16 = vld [vmem:[%s1949_s3 + $0x180] sm:$0xff]  ;;  %v458_v17 = vld [vmem:[%s1949_s3 + $0x190] sm:$0xff]  ;;  %p1262_p13 = pnand %p1261_p12, %p1422_p4 }
  0x1a   : > { %575 = vmatprep.subr.mxu1 %v463_v11  ;;  %499 = vmatpush1.msra.mxu0 %v460_v12  ;;  %v453_v26 = vld [vmem:[%s1949_s3 + $0x168] sm:$0xff]  ;;  %v455_v27 = vld [vmem:[%s1949_s3 + $0x178] sm:$0xff]  ;;  %v452_v28 = vld [vmem:[%s1949_s3 + $0x160] sm:$0xff]  ;;  %v1338_v12 = vmov 0.0   ;;  %p1269_p3 = por %p1268_p2, %p1267_p1 }
  0x1b   : > { %576 = vmatpush1.msra.mxu1 %v462_v13  ;;  %500 = vmatprep.subr.mxu0 %v457_v14  ;;  %v454_v29 = vld [vmem:[%s1949_s3 + $0x170] sm:$0xff]  ;;  %v449_v30 = vld [vmem:[%s1949_s3 + $0x148] sm:$0xff]  ;;  %v451_v31 = vld [vmem:[%s1949_s3 + $0x158] sm:$0xff]  ;;  %p1263_p0 = pneg %p1262_p13 }
  0x1c   : > { %365 = vadd.xlane.f32.xlu0 %v1444_v1  ;;  %577 = vmatprep.subr.mxu1 %v459_v15  ;;  %v448_v32 = vld [vmem:[%s1949_s3 + $0x140] sm:$0xff]  ;;  %v450_v33 = vld [vmem:[%s1949_s3 + $0x150] sm:$0xff]  ;;  %v445_v34 = vld [vmem:[%s1949_s3 + $0x128] sm:$0xff] }
  0x1d   : > { %501 = vmatpush1.msra.mxu0 %v456_v16  ;;  %578 = vmatpush1.msra.mxu1 %v458_v17  ;;  %v447_v35 = vld [vmem:[%s1949_s3 + $0x138] sm:$0xff]  ;;  %v444_v36 = vld [vmem:[%s1949_s3 + $0x120] sm:$0xff]  ;;  %v446_v37 = vld [vmem:[%s1949_s3 + $0x130] sm:$0xff]  ;;  %p1270_p5 = pnand %p1269_p3, %p1263_p0 }
  0x1e   : > { %502 = vmatprep.subr.mxu0 %v453_v26  ;;  %579 = vmatprep.subr.mxu1 %v455_v27  ;;  %v441_v38 = vld [vmem:[%s1949_s3 + $0x108] sm:$0xff]  ;;  %v443_v39 = vld [vmem:[%s1949_s3 + $0x118] sm:$0xff]  ;;  %v440_v40 = vld [vmem:[%s1949_s3 + $0x100] sm:$0xff] }
  0x1f   : > { %503 = vmatpush1.msra.mxu0 %v452_v28  ;;  %580 = vmatpush1.msra.mxu1 %v454_v29  ;;  %v442_v41 = vld [vmem:[%s1949_s3 + $0x110] sm:$0xff]  ;;  %v437_v42 = vld [vmem:[%s1949_s3 + $0xe8] sm:$0xff]  ;;  %v439_v43 = vld [vmem:[%s1949_s3 + $0xf8] sm:$0xff] }
  0x20   : > { %504 = vmatprep.subr.mxu0 %v449_v30  ;;  %581 = vmatprep.subr.mxu1 %v451_v31  ;;  %v436_v44 = vld [vmem:[%s1949_s3 + $0xe0] sm:$0xff]  ;;  %v438_v45 = vld [vmem:[%s1949_s3 + $0xf0] sm:$0xff]  ;;  %v433_v46 = vld [vmem:[%s1949_s3 + $0xc8] sm:$0xff] }
  0x21   : > { %505 = vmatpush1.msra.mxu0 %v448_v32  ;;  %582 = vmatpush1.msra.mxu1 %v450_v33  ;;  %v435_v47 = vld [vmem:[%s1949_s3 + $0xd8] sm:$0xff]  ;;  %v432_v48 = vld [vmem:[%s1949_s3 + $0xc0] sm:$0xff]  ;;  %v434_v49 = vld [vmem:[%s1949_s3 + $0xd0] sm:$0xff] }
  0x22   : > { %506 = vmatprep.subr.mxu0 %v445_v34  ;;  %583 = vmatprep.subr.mxu1 %v447_v35  ;;  %v429_v50 = vld [vmem:[%s1949_s3 + $0xa8] sm:$0xff]  ;;  %v431_v51 = vld [vmem:[%s1949_s3 + $0xb8] sm:$0xff]  ;;  %v428_v52 = vld [vmem:[%s1949_s3 + $0xa0] sm:$0xff] }
  0x23   : > { %507 = vmatpush1.msra.mxu0 %v444_v36  ;;  %584 = vmatpush1.msra.mxu1 %v446_v37  ;;  %v430_v53 = vld [vmem:[%s1949_s3 + $0xb0] sm:$0xff]  ;;  %v425_v54 = vld [vmem:[%s1949_s3 + $0x88] sm:$0xff]  ;;  %v427_v55 = vld [vmem:[%s1949_s3 + $0x98] sm:$0xff] }
  0x24   : > { %508 = vmatprep.subr.mxu0 %v441_v38  ;;  %585 = vmatprep.subr.mxu1 %v443_v39  ;;  %v424_v56 = vld [vmem:[%s1949_s3 + $0x80] sm:$0xff]  ;;  %v426_v57 = vld [vmem:[%s1949_s3 + $0x90] sm:$0xff]  ;;  %v421_v58 = vld [vmem:[%s1949_s3 + $0x68] sm:$0xff] }
  0x25   : > { %509 = vmatpush1.msra.mxu0 %v440_v40  ;;  %586 = vmatpush1.msra.mxu1 %v442_v41  ;;  %v423_v59 = vld [vmem:[%s1949_s3 + $0x78] sm:$0xff]  ;;  %v420_v60 = vld [vmem:[%s1949_s3 + $0x60] sm:$0xff]  ;;  %v422_v61 = vld [vmem:[%s1949_s3 + $0x70] sm:$0xff] }
  0x26   : > { %510 = vmatprep.subr.mxu0 %v437_v42  ;;  %587 = vmatprep.subr.mxu1 %v439_v43  ;;  %v417_v62 = vld [vmem:[%s1949_s3 + $0x48] sm:$0xff]  ;;  %v419_v63 = vld [vmem:[%s1949_s3 + $0x58] sm:$0xff]  ;;  %v416_v2 = vld [vmem:[%s1949_s3 + $0x40] sm:$0xff] }
  0x27   : > { %511 = vmatpush1.msra.mxu0 %v436_v44  ;;  %588 = vmatpush1.msra.mxu1 %v438_v45  ;;  %v418_v3 = vld [vmem:[%s1949_s3 + $0x50] sm:$0xff]  ;;  %v413_v4 = vld [vmem:[%s1949_s3 + $0x28] sm:$0xff]  ;;  %v415_v5 = vld [vmem:[%s1949_s3 + $0x38] sm:$0xff] }
  0x28   : > { %512 = vmatprep.subr.mxu0 %v433_v46  ;;  %589 = vmatprep.subr.mxu1 %v435_v47  ;;  %v412_v6 = vld [vmem:[%s1949_s3 + $0x20] sm:$0xff]  ;;  %v414_v7 = vld [vmem:[%s1949_s3 + $0x30] sm:$0xff]  ;;  %v409_v8 = vld [vmem:[%s1949_s3 + $0x8] sm:$0xff] }
  0x29   : > { %513 = vmatpush1.msra.mxu0 %v432_v48  ;;  %590 = vmatpush1.msra.mxu1 %v434_v49  ;;  %v411_v9 = vld [vmem:[%s1949_s3 + $0x18] sm:$0xff]  ;;  %v408_v10 = vld [vmem:[%s1949_s3] sm:$0xff]  ;;  %v410_v11 = vld [vmem:[%s1949_s3 + $0x10] sm:$0xff] }
  0x2a   : > { %514 = vmatprep.subr.mxu0 %v429_v50  ;;  %591 = vmatprep.subr.mxu1 %v431_v51  ;;  %v785_v31 = vld [vmem:[%s1951_s5 + $0x1f8] sm:$0xff]  ;;  %v752_v33 = vld [vmem:[%s1951_s5 + $0xf0] sm:$0xff]  ;;  %v751_v37 = vld [vmem:[%s1951_s5 + $0xe8] sm:$0xff] }
  0x2b   : > { %515 = vmatpush1.msra.mxu0 %v428_v52  ;;  %592 = vmatpush1.msra.mxu1 %v430_v53  ;;  %v769_v32 = vld [vmem:[%s1951_s5 + $0x178] sm:$0xff]  ;;  %v784_v34 = vld [vmem:[%s1951_s5 + $0x1f0] sm:$0xff]  ;;  %v783_v38 = vld [vmem:[%s1951_s5 + $0x1e8] sm:$0xff] }
  0x2c   : > { %516 = vmatprep.subr.mxu0 %v425_v54  ;;  %593 = vmatprep.subr.mxu1 %v427_v55  ;;  %v736_v35 = vld [vmem:[%s1951_s5 + $0x70] sm:$0xff]  ;;  %v735_v39 = vld [vmem:[%s1951_s5 + $0x68] sm:$0xff]  ;;  %v750_v41 = vld [vmem:[%s1951_s5 + $0xe0] sm:$0xff] }
  0x2d   : > { %517 = vmatpush1.msra.mxu0 %v424_v56  ;;  %594 = vmatpush1.msra.mxu1 %v426_v57  ;;  %v768_v36 = vld [vmem:[%s1951_s5 + $0x170] sm:$0xff]  ;;  %v767_v40 = vld [vmem:[%s1951_s5 + $0x168] sm:$0xff]  ;;  %v782_v42 = vld [vmem:[%s1951_s5 + $0x1e0] sm:$0xff] }
  0x2e   : > { %518 = vmatprep.subr.mxu0 %v421_v58  ;;  %595 = vmatprep.subr.mxu1 %v423_v59  ;;  %v734_v43 = vld [vmem:[%s1951_s5 + $0x60] sm:$0xff]  ;;  %v749_v45 = vld [vmem:[%s1951_s5 + $0xd8] sm:$0xff]  ;;  %v748_v49 = vld [vmem:[%s1951_s5 + $0xd0] sm:$0xff] }
  0x2f   : > { %519 = vmatpush1.msra.mxu0 %v420_v60  ;;  %596 = vmatpush1.msra.mxu1 %v422_v61  ;;  %v766_v44 = vld [vmem:[%s1951_s5 + $0x160] sm:$0xff]  ;;  %v781_v46 = vld [vmem:[%s1951_s5 + $0x1d8] sm:$0xff]  ;;  %v780_v50 = vld [vmem:[%s1951_s5 + $0x1d0] sm:$0xff] }
  0x30   : > { %520 = vmatprep.subr.mxu0 %v417_v62  ;;  %597 = vmatprep.subr.mxu1 %v419_v63  ;;  %v733_v47 = vld [vmem:[%s1951_s5 + $0x58] sm:$0xff]  ;;  %v732_v51 = vld [vmem:[%s1951_s5 + $0x50] sm:$0xff]  ;;  %v747_v53 = vld [vmem:[%s1951_s5 + $0xc8] sm:$0xff] }
  0x31   : > { %521 = vmatpush1.msra.mxu0 %v416_v2  ;;  %598 = vmatpush1.msra.mxu1 %v418_v3  ;;  %v765_v48 = vld [vmem:[%s1951_s5 + $0x158] sm:$0xff]  ;;  %v764_v52 = vld [vmem:[%s1951_s5 + $0x150] sm:$0xff]  ;;  %v779_v54 = vld [vmem:[%s1951_s5 + $0x1c8] sm:$0xff] }
  0x32   : > { %522 = vmatprep.subr.mxu0 %v413_v4  ;;  %599 = vmatprep.subr.mxu1 %v415_v5  ;;  %v731_v55 = vld [vmem:[%s1951_s5 + $0x48] sm:$0xff]  ;;  %v746_v57 = vld [vmem:[%s1951_s5 + $0xc0] sm:$0xff]  ;;  %v745_v61 = vld [vmem:[%s1951_s5 + $0xb8] sm:$0xff] }
  0x33   : > { %523 = vmatpush1.msra.mxu0 %v412_v6  ;;  %600 = vmatpush1.msra.mxu1 %v414_v7  ;;  %v763_v56 = vld [vmem:[%s1951_s5 + $0x148] sm:$0xff]  ;;  %v778_v58 = vld [vmem:[%s1951_s5 + $0x1c0] sm:$0xff]  ;;  %v777_v62 = vld [vmem:[%s1951_s5 + $0x1b8] sm:$0xff] }
  0x34   : > { %524 = vmatprep.subr.mxu0 %v409_v8  ;;  %601 = vmatprep.subr.mxu1 %v411_v9  ;;  %v730_v59 = vld [vmem:[%s1951_s5 + $0x40] sm:$0xff]  ;;  %v729_v63 = vld [vmem:[%s1951_s5 + $0x38] sm:$0xff]  ;;  %v744_v3 = vld [vmem:[%s1951_s5 + $0xb0] sm:$0xff] }
  0x35   : > { %525 = vmatpush1.msra.mxu0 %v408_v10  ;;  %558 = vmatprep.mubr.f32.mxu0 %v1338_v12  ;;  %v762_v60 = vld [vmem:[%s1951_s5 + $0x140] sm:$0xff]  ;;  %v761_v2 = vld [vmem:[%s1951_s5 + $0x138] sm:$0xff]  ;;  %v776_v4 = vld [vmem:[%s1951_s5 + $0x1b0] sm:$0xff] }
  0x36   : > { %602 = vmatpush1.msra.mxu1 %v410_v11  ;;  %635 = vmatprep.mubr.f32.mxu1 %v1338_v12  ;;  %v728_v5 = vld [vmem:[%s1951_s5 + $0x30] sm:$0xff]  ;;  %v743_v7 = vld [vmem:[%s1951_s5 + $0xa8] sm:$0xff]  ;;  %v742_v11 = vld [vmem:[%s1951_s5 + $0xa0] sm:$0xff] }
  0x37   : > { %1144 = vmatprep.subr.mxu1 %v785_v31  ;;  %v760_v6 = vld [vmem:[%s1951_s5 + $0x130] sm:$0xff]  ;;  %v775_v8 = vld [vmem:[%s1951_s5 + $0x1a8] sm:$0xff]  ;;  %v754_v31 = vld [vmem:[%s1951_s5 + $0x100] sm:$0xff] }
  0x38   : > { %v727_v9 = vld [vmem:[%s1951_s5 + $0x28] sm:$0xff] }
  0x39   : > { %v759_v10 = vld [vmem:[%s1951_s5 + $0x128] sm:$0xff] }
  0xa1   : > { %v364_v18 = vpop.xlane.xlu0 %363 }
  0xa2   : > { %v368_v19 = vmul.f32 0.0078125, %v364_v18 }
  0xa4   : > { %v1496_v20 = vsub.f32 %v1441_v0, %v368_v19 }
  0xa5   : > { %v366_v21 = vpop.xlane.xlu0 %365 }
  0xa6   : > { %v369_v22 = vmul.f32 0.0078125, %v366_v21  ;;  %v372_v23 = vmul.f32 %v1496_v20, %v1496_v20  ;;  %v1097_v21 = vld [vmem:[%s1947_s1] ss:$0 sm:$0xff] }
  0xa8   : > { %v1501_v24 = vsub.f32 %v1444_v1, %v369_v22  ;;  %374 = vadd.xlane.f32.xlu1 %v372_v23  ;;  %v1098_v23 = vld [vmem:[%s1948_s2] ss:$0 sm:$0xff] }
  0xaa   : > { %v373_v25 = vmul.f32 %v1501_v24, %v1501_v24 }
  0xac   : > { %376 = vadd.xlane.f32.xlu1 %v373_v25 }
 0x131   : > { %v375_v13 = vpop.xlane.xlu1 %374 }
 0x132   : > { %v378_v14 = vmul.f32 0.0078125, %v375_v13  ;;  %v726_v13 = vld [vmem:[%s1951_s5 + $0x20] sm:$0xff] }
 0x134   : > { %v380_v15 = vadd.f32 1e-06, %v378_v14  ;;  %v758_v14 = vld [vmem:[%s1951_s5 + $0x120] sm:$0xff] }
 0x135   : > { %v377_v16 = vpop.xlane.xlu1 %376 }
 0x136   : > { %1240 = vrsqrt.f32 %v380_v15  ;;  %v379_v17 = vmul.f32 0.0078125, %v377_v16  ;;  %v741_v15 = vld [vmem:[%s1951_s5 + $0x98] sm:$0xff] }
 0x137   : > { %v773_v16 = vld [vmem:[%s1951_s5 + $0x198] sm:$0xff] }
 0x138   : > { %v381_v18 = vadd.f32 1e-06, %v379_v17  ;;  %v725_v17 = vld [vmem:[%s1951_s5 + $0x18] sm:$0xff] }
 0x13a   : > { %1242 = vrsqrt.f32 %v381_v18  ;;  %v757_v18 = vld [vmem:[%s1951_s5 + $0x118] sm:$0xff] }
 0x143   : > { %v1241_v19 = vpop.eup %1240 }
 0x144   : > { %v384_v22 = vmul.f32 %v1241_v19, %v1496_v20  ;;  %v753_v20 = vld [vmem:[%s1951_s5 + $0xf8] sm:$0xff]  ;;  %v740_v19 = vld [vmem:[%s1951_s5 + $0x90] sm:$0xff] }
 0x145   : > { %1106 = vmatprep.subr.mxu0 %v753_v20  ;;  %v722_v20 = vld [vmem:[%s1951_s5] sm:$0xff] }
 0x146   : > { %v393_v25 = vmul.f32 %v1097_v21, %v384_v22  ;;  %v724_v22 = vld [vmem:[%s1951_s5 + $0x10] sm:$0xff] }
 0x147   : > { %v1243_v26 = vpop.eup %1242 }
 0x148   : > { %v402_v27 = vadd.f32 %v1098_v23, %v393_v25  ;;  %v385_v28 = vmul.f32 %v1243_v26, %v1501_v24  ;;  %v737_v24 = vld [vmem:[%s1951_s5 + $0x78] sm:$0xff]  ;;  %v739_v25 = vld [vmem:[%s1951_s5 + $0x88] sm:$0xff] }
 0x149   : > { %v771_v26 = vld [vmem:[%s1951_s5 + $0x188] sm:$0xff] }
 0x14a   : > { %559 = vmatmul.mubr.f32.vlgmr.msra.gmra.mxu0 %v402_v27  ;;  %636 = vmatmul.mubr.f32.vlgmr.msra.gmra.mxu1 %v402_v27  ;;  %v394_v29 = vmul.f32 %v1097_v21, %v385_v28  ;;  %v772_v21 = vld [vmem:[%s1951_s5 + $0x190] sm:$0xff]  ;;  %v723_v27 = vld [vmem:[%s1951_s5 + $0x8] sm:$0xff] }
 0x14b   : > { %564 = vmatprep.mubr.f32.mxu0 %v1338_v12  ;;  %641 = vmatprep.mubr.f32.mxu1 %v1338_v12  ;;  %v774_v12 = vld [vmem:[%s1951_s5 + $0x1a0] sm:$0xff]  ;;  %v755_v28 = vld [vmem:[%s1951_s5 + $0x108] sm:$0xff] }
 0x14c   : > { %v403_v30 = vadd.f32 %v1098_v23, %v394_v29  ;;  %1107 = vmatpush3.msra.mxu0 %v737_v24  ;;  %1145 = vmatpush3.msra.mxu1 %v769_v32  ;;  %v756_v23 = vld [vmem:[%s1951_s5 + $0x110] sm:$0xff]  ;;  %v738_v29 = vld [vmem:[%s1951_s5 + $0x80] sm:$0xff]  ;;  %v474_v24 = vlaneseq }
 0x14d   : > { %1108 = vmatprep.subr.mxu0 %v752_v33  ;;  %1146 = vmatprep.subr.mxu1 %v784_v34 }
 0x14e   : > { %565 = vmatmul.mubr.f32.gmra.mxu0 %v403_v30  ;;  %642 = vmatmul.mubr.f32.gmra.mxu1 %v403_v30  ;;  %v770_v30 = vld [vmem:[%s1951_s5 + $0x180] sm:$0xff]  ;;  %v475_v32 = vshrl.u32 %v474_v24, 7 }
 0x14f   : > { %1109 = vmatpush3.msra.mxu0 %v736_v35  ;;  %1147 = vmatpush3.msra.mxu1 %v768_v36  ;;  %v472_v35 = vld [vmem:[%s1950_s4] sm:$0xf] }
 0x150   : > { %1110 = vmatprep.subr.mxu0 %v751_v37  ;;  %1148 = vmatprep.subr.mxu1 %v783_v38  ;;  %v476_v33 = vsub.s32 0, %v475_v32  ;;  %v484_v34 = vsub.s32 2, %v475_v32  ;;  %v480_v36 = vsub.s32 1, %v475_v32  ;;  %v488_v37 = vsub.s32 3, %v475_v32 }
 0x151   : > { %1111 = vmatpush3.msra.mxu0 %v735_v39  ;;  %1149 = vmatpush3.msra.mxu1 %v767_v40 }
 0x152   : > { %1112 = vmatprep.subr.mxu0 %v750_v41  ;;  %1150 = vmatprep.subr.mxu1 %v782_v42  ;;  %v477_v38 = vrot.slane %v472_v35, %v476_v33  ;;  %v485_v39 = vrot.slane %v472_v35, %v484_v34  ;;  %v481_v42 = vrot.slane %v472_v35, %v480_v36 }
 0x153   : > { %1113 = vmatpush3.msra.mxu0 %v734_v43  ;;  %1151 = vmatpush3.msra.mxu1 %v766_v44  ;;  %v489_v43 = vrot.slane %v472_v35, %v488_v37 }
 0x154   : > { %1114 = vmatprep.subr.mxu0 %v749_v45  ;;  %1152 = vmatprep.subr.mxu1 %v781_v46 }
 0x155   : > { %1115 = vmatpush3.msra.mxu0 %v733_v47  ;;  %1153 = vmatpush3.msra.mxu1 %v765_v48 }
 0x156   : > { %1116 = vmatprep.subr.mxu0 %v748_v49  ;;  %1154 = vmatprep.subr.mxu1 %v780_v50 }
 0x157   : > { %1117 = vmatpush3.msra.mxu0 %v732_v51  ;;  %1155 = vmatpush3.msra.mxu1 %v764_v52 }
 0x158   : > { %1118 = vmatprep.subr.mxu0 %v747_v53  ;;  %1156 = vmatprep.subr.mxu1 %v779_v54 }
 0x159   : > { %1119 = vmatpush3.msra.mxu0 %v731_v55  ;;  %1157 = vmatpush3.msra.mxu1 %v763_v56 }
 0x15a   : > { %1120 = vmatprep.subr.mxu0 %v746_v57  ;;  %1158 = vmatprep.subr.mxu1 %v778_v58 }
 0x15b   : > { %1121 = vmatpush3.msra.mxu0 %v730_v59  ;;  %1159 = vmatpush3.msra.mxu1 %v762_v60 }
 0x15c   : > { %1122 = vmatprep.subr.mxu0 %v745_v61  ;;  %1160 = vmatprep.subr.mxu1 %v777_v62 }
 0x15d   : > { %1123 = vmatpush3.msra.mxu0 %v729_v63  ;;  %1161 = vmatpush3.msra.mxu1 %v761_v2 }
 0x15e   : > { %1124 = vmatprep.subr.mxu0 %v744_v3  ;;  %1162 = vmatprep.subr.mxu1 %v776_v4 }
 0x15f   : > { %1125 = vmatpush3.msra.mxu0 %v728_v5  ;;  %1163 = vmatpush3.msra.mxu1 %v760_v6 }
 0x160   : > { %1126 = vmatprep.subr.mxu0 %v743_v7  ;;  %1164 = vmatprep.subr.mxu1 %v775_v8 }
 0x161   : > { %1127 = vmatpush3.msra.mxu0 %v727_v9  ;;  %1165 = vmatpush3.msra.mxu1 %v759_v10 }
 0x162   : > { %1128 = vmatprep.subr.mxu0 %v742_v11  ;;  %1166 = vmatprep.subr.mxu1 %v774_v12 }
 0x163   : > { %1129 = vmatpush3.msra.mxu0 %v726_v13  ;;  %1167 = vmatpush3.msra.mxu1 %v758_v14 }
 0x164   : > { %1130 = vmatprep.subr.mxu0 %v741_v15  ;;  %1168 = vmatprep.subr.mxu1 %v773_v16 }
 0x165   : > { %1131 = vmatpush3.msra.mxu0 %v725_v17  ;;  %1169 = vmatpush3.msra.mxu1 %v757_v18 }
 0x166   : > { %1132 = vmatprep.subr.mxu0 %v740_v19  ;;  %1170 = vmatprep.subr.mxu1 %v772_v21 }
 0x167   : > { %1133 = vmatpush3.msra.mxu0 %v724_v22  ;;  %1171 = vmatpush3.msra.mxu1 %v756_v23 }
 0x168   : > { %1134 = vmatprep.subr.mxu0 %v739_v25  ;;  %1172 = vmatprep.subr.mxu1 %v771_v26 }
 0x169   : > { %1135 = vmatpush3.msra.mxu0 %v723_v27  ;;  %1173 = vmatpush3.msra.mxu1 %v755_v28 }
 0x16a   : > { %1136 = vmatprep.subr.mxu0 %v738_v29  ;;  %1174 = vmatprep.subr.mxu1 %v770_v30 }
 0x16b   : > { %1137 = vmatpush3.msra.mxu0 %v722_v20  ;;  %1175 = vmatpush3.msra.mxu1 %v754_v31 }
 0x20a   : > { %v560_v40 = vpop.f32.mrf.mxu0  ;;  %v637_v41 = vpop.f32.mrf.mxu1 }
 0x20b   : > { %v1852_v44 = vadd.f32 %v560_v40, %v477_v38  ;;  %v1854_v45 = vadd.f32 %v637_v41, %v485_v39 }
 0x20c   : > { %v562_v46 = vpop.f32.mrf.mxu0  ;;  %v639_v47 = vpop.f32.mrf.mxu1 }
 0x20d   : > { %v656_v48 = vmul.f32 0.044715, %v1852_v44  ;;  %v658_v49 = vmul.f32 0.044715, %v1854_v45  ;;  %v563_v50 = vadd.f32 %v562_v46, %v481_v42  ;;  %v1858_v51 = vadd.f32 %v639_v47, %v489_v43 }
 0x20e   : > { %v566_v52 = vpop.f32.mrf.mxu0  ;;  %v643_v53 = vpop.f32.mrf.mxu1  ;;  %v648_v46 = vmul.f32 0.5, %v1852_v44 }
 0x20f   : > { %v664_v54 = vmul.f32 %v656_v48, %v1852_v44  ;;  %v666_v55 = vmul.f32 %v658_v49, %v1854_v45  ;;  %v1862_v56 = vadd.f32 %v566_v52, %v477_v38  ;;  %v1864_v57 = vadd.f32 %v643_v53, %v485_v39 }
 0x210   : > { %v657_v58 = vmul.f32 0.044715, %v563_v50  ;;  %v659_v59 = vmul.f32 0.044715, %v1858_v51  ;;  %v568_v60 = vpop.f32.mrf.mxu0  ;;  %v645_v61 = vpop.f32.mrf.mxu1  ;;  %v649_v41 = vmul.f32 0.5, %v563_v50  ;;  %v651_v47 = vmul.f32 0.5, %v1858_v51 }
 0x211   : > { %v672_v62 = vmul.f32 %v664_v54, %v1852_v44  ;;  %v674_v63 = vmul.f32 %v666_v55, %v1854_v45  ;;  %v660_v2 = vmul.f32 0.044715, %v1862_v56  ;;  %v662_v3 = vmul.f32 0.044715, %v1864_v57 }
 0x212   : > { %v665_v4 = vmul.f32 %v657_v58, %v563_v50  ;;  %v667_v5 = vmul.f32 %v659_v59, %v1858_v51  ;;  %v569_v6 = vadd.f32 %v568_v60, %v481_v42  ;;  %v646_v7 = vadd.f32 %v645_v61, %v489_v43 }
 0x213   : > { %v680_v8 = vadd.f32 %v672_v62, %v1852_v44  ;;  %v682_v9 = vadd.f32 %v674_v63, %v1854_v45  ;;  %v668_v10 = vmul.f32 %v660_v2, %v1862_v56  ;;  %v670_v17 = vmul.f32 %v662_v3, %v1864_v57 }
 0x214   : > { %v661_v11 = vmul.f32 0.044715, %v569_v6  ;;  %v663_v12 = vmul.f32 0.044715, %v646_v7  ;;  %v673_v13 = vmul.f32 %v665_v4, %v563_v50  ;;  %v675_v14 = vmul.f32 %v667_v5, %v1858_v51 }
 0x215   : > { %v688_v15 = vmul.f32 0.7978846, %v680_v8  ;;  %v690_v16 = vmul.f32 0.7978846, %v682_v9  ;;  %v676_v23 = vmul.f32 %v668_v10, %v1862_v56  ;;  %v678_v30 = vmul.f32 %v670_v17, %v1864_v57 }
 0x216   : > { %v669_v18 = vmul.f32 %v661_v11, %v569_v6  ;;  %v671_v19 = vmul.f32 %v663_v12, %v646_v7  ;;  %v681_v21 = vadd.f32 %v673_v13, %v563_v50  ;;  %v683_v22 = vadd.f32 %v675_v14, %v1858_v51 }
 0x217   : > { %1244 = vtanh.f32 %v688_v15  ;;  %v684_v29 = vadd.f32 %v676_v23, %v1862_v56  ;;  %v686_v32 = vadd.f32 %v678_v30, %v1864_v57  ;;  %v650_v52 = vmul.f32 0.5, %v1854_v45 }
 0x218   : > { %1246 = vtanh.f32 %v690_v16  ;;  %v689_v25 = vmul.f32 0.7978846, %v681_v21  ;;  %v691_v26 = vmul.f32 0.7978846, %v683_v22  ;;  %v677_v27 = vmul.f32 %v669_v18, %v569_v6 }
 0x219   : > { %v679_v28 = vmul.f32 %v671_v19, %v646_v7  ;;  %v692_v24 = vmul.f32 0.7978846, %v684_v29  ;;  %v694_v35 = vmul.f32 0.7978846, %v686_v32  ;;  %v653_v62 = vmul.f32 0.5, %v569_v6 }
 0x21a   : > { %1248 = vtanh.f32 %v689_v25  ;;  %v685_v20 = vadd.f32 %v677_v27, %v569_v6  ;;  %v655_v44 = vmul.f32 0.5, %v646_v7  ;;  %v652_v51 = vmul.f32 0.5, %v1862_v56 }
 0x21b   : > { %1250 = vtanh.f32 %v691_v26  ;;  %v687_v31 = vadd.f32 %v679_v28, %v646_v7  ;;  %v654_v3 = vmul.f32 0.5, %v1864_v57  ;;  %v1099_v57 = vld [vmem:[%s1952_s6] ss:$0 sm:$0xff] }
 0x21c   : > { %v693_v33 = vmul.f32 0.7978846, %v685_v20  ;;  %1252 = vtanh.f32 %v692_v24 }
 0x21d   : > { %v695_v34 = vmul.f32 0.7978846, %v687_v31 }
 0x21e   : > { %1254 = vtanh.f32 %v693_v33 }
 0x21f   : > { %1256 = vtanh.f32 %v695_v34 }
 0x220   : > { %1258 = vtanh.f32 %v694_v35 }
 0x224   : > { %v1245_v36 = vpop.eup %1244 }
 0x225   : > { %v1247_v37 = vpop.eup %1246  ;;  %v704_v39 = vadd.f32 1.0, %v1245_v36 }
 0x226   : > { %v706_v43 = vadd.f32 1.0, %v1247_v37 }
 0x227   : > { %v1249_v38 = vpop.eup %1248  ;;  %v712_v58 = vmul.f32 %v704_v39, %v648_v46 }
 0x228   : > { %v1251_v40 = vpop.eup %1250  ;;  %v705_v42 = vadd.f32 1.0, %v1249_v38  ;;  %v714_v61 = vmul.f32 %v706_v43, %v650_v52 }
 0x229   : > { %v707_v48 = vadd.f32 1.0, %v1251_v40  ;;  %v1253_v49 = vpop.eup %1252 }
 0x22a   : > { %v713_v53 = vmul.f32 %v705_v42, %v649_v41  ;;  %v708_v59 = vadd.f32 1.0, %v1253_v49 }
 0x22b   : > { %v1255_v54 = vpop.eup %1254  ;;  %v715_v55 = vmul.f32 %v707_v48, %v651_v47 }
 0x22c   : > { %v1257_v60 = vpop.eup %1256  ;;  %850 = vmatprep.mubr.f32.mxu0 %v713_v53  ;;  %v709_v50 = vadd.f32 1.0, %v1255_v54  ;;  %v716_v8 = vmul.f32 %v708_v59, %v652_v51 }
 0x22d   : > { %v1259_v63 = vpop.eup %1258  ;;  %925 = vmatprep.mubr.f32.mxu1 %v715_v55  ;;  %851 = vmatmul.mubr.f32.vlgmr.msra.gmra.mxu0 %v712_v58  ;;  %v711_v2 = vadd.f32 1.0, %v1257_v60 }
 0x22e   : > { %926 = vmatmul.mubr.f32.vlgmr.msra.gmra.mxu1 %v714_v61  ;;  %v717_v45 = vmul.f32 %v709_v50, %v653_v62  ;;  %v710_v4 = vadd.f32 1.0, %v1259_v63 }
 0x22f   : > { %v719_v5 = vmul.f32 %v711_v2, %v655_v44 }
 0x230   : > { %855 = vmatprep.mubr.f32.mxu0 %v717_v45  ;;  %v718_v9 = vmul.f32 %v710_v4, %v654_v3 }
 0x231   : > { %930 = vmatprep.mubr.f32.mxu1 %v719_v5  ;;  %856 = vmatmul.mubr.f32.gmra.mxu0 %v716_v8 }
 0x232   : > { %931 = vmatmul.mubr.f32.gmra.mxu1 %v718_v9 }
 0x2ed   : > { %v1138_v6 = vpop.f32.mrf.mxu0 }
 0x2ee   : > { %v1176_v10 = vpop.f32.mrf.mxu1 }
 0x2ef   : > { %v1139_v11 = vpop.f32.mrf.mxu0 }
 0x2f0   : > { %v1140_v7 = vadd.f32 %v1139_v11, %v1138_v6  ;;  %v1177_v56 = vpop.f32.mrf.mxu1 }
 0x2f1   : > { %v1178_v12 = vadd.f32 %v1177_v56, %v1176_v10  ;;  %v1141_v13 = vpop.f32.mrf.mxu0 }
 0x2f2   : > { %v1179_v14 = vpop.f32.mrf.mxu1 }
 0x2f3   : > { %v928_v15 = vadd.f32 %v1178_v12, %v1140_v7  ;;  %v1142_v16 = vpop.f32.mrf.mxu0 }
 0x2f4   : > { %v1143_v17 = vadd.f32 %v1142_v16, %v1141_v13  ;;  %v1180_v18 = vpop.f32.mrf.mxu1 }
 0x2f5   : > { %v952_v19 = vadd.f32 %v1099_v57, %v928_v15  ;;  %v1181_v21 = vadd.f32 %v1180_v18, %v1179_v14 }
 0x2f7   : > { %v956_v22 = vadd.f32 %v952_v19, %v1441_v0  ;;  %v933_v23 = vadd.f32 %v1181_v21, %v1143_v17 }
 0x2f9   : > { %958 = vst [vmem:[%s330_s12] sm:$0xff] %v956_v22  ;;  %v953_v25 = vadd.f32 %v1099_v57, %v933_v23 }
 0x2fb   : > { %v957_v26 = vadd.f32 %v953_v25, %v1444_v1 }
 0x2fd   : > { %959 = vst [vmem:[%s330_s12 + $0x8] sm:$0xff] %v957_v26 }
 0x2fe   : > { %1273 = shalt.err (!%p1270_p5)
}
 0x2ff   : > { %s1274_s22 = scalar_lea.hbm %s1896_s18, 256  ;;  %s1278_s10 = scalar_lea.hbm %s1953_s7, 512 }
 0x300   : > { %p1275_p6 = scmp.ne.s32.totalorder %s1896_s18, %s1274_s22  ;;  %p1279_p10 = scmp.lt.s32.totalorder %s1896_s18, %s1953_s7 }
 0x301   : > { %p1280_p11 = scmp.lt.s32.totalorder %s1278_s10, %s1274_s22 }
 0x302   : > { %p1276_p7 = pnand %p1275_p6, %p1422_p4 }
 0x303   : > { %p1281_p12 = por %p1280_p11, %p1279_p10 }
 0x304   : > { %p1277_p9 = pneg %p1276_p7 }
 0x306   : > { %p1282_p13 = pnand %p1281_p12, %p1277_p9 }
 0x308   : > { %1285 = shalt.err (!%p1282_p13)
}
 0x309   : > { %s1340_s17 = smov 128   ;;  %s1341_s27 = smov 8  }
 0x30a   : > { %1182 = dma.vmem_to_hbm [thread:$0]  (%p1422_p4), %s1898_s15, 256, %s1896_s18, %s1901_s19, %s1340_s17, %s1340_s17, %s1341_s27  }
 0x30b PF: > { %p1188_p0 = scmp.ge.s32.totalorder %s1336_s29, 2  ;;  %s989_s20 = sand.u32 1, %s1316_s24  }
 0x30c   : > { %s990_s21 = scalar_lea.sflag [#allocation5], %s989_s20 }
 0x30d   : > { %p1185_p1 = pnand %p1188_p0, %p1429_p8 }
 0x30f   : > { %p1186_p2 = pneg %p1185_p1 }
 0x311   : > { %1311 = dma.done.wait (%p1186_p2), %s990_s21, 256  }
 0x312   : > { %1313 = vsyncadd (%p1186_p2), %s990_s21, 4294967040  ;;  %s20_s29 = sadd.s32 1, %s1336_s29   ;;  %s1956_s24 = smov %s1320_s25 }
 0x313   : > { %p17_p3 = scmp.ge.s32.totalorder %s20_s29, 4   ;;  %s1957_s25 = smov %s1324_s26 }
 0x314   : > { %s1958_s26 = smov %s1435_s14  ;;  %s1959_s27 = smov %s1332_s28 }
 0x315   : > { %s1960_s28 = smov %s1962_s9  ;;  %19 = sbr.rel (!%p17_p3) target bundleno = 4 (0x4), region = 100 }
 0x31a   :  { %995 = vsyncpa [#allocation5], 1 }
 0x31b   :  { %997 = vsyncpa [#allocation5 + $0x1], 1 }

</bundles_post_ra>
